<compile_context>
chip_gen: v5e
topology: v5e:2x2
jax: 0.10.0
libtpu: 0.0.40
codegen_flags: <defaults>
</compile_context>

<pallas_src>
import functools

import jax
import jax.numpy as jnp
from jax.experimental import pallas as pl
from jax.experimental.pallas import tpu as pltpu

f32 = jnp.float32


# ------------------------------ Pallas kernel ------------------------------

def _np_drug_response_kernel(
    drug_x_ref, cell_x_ref, np_ref,
    w_de_ref, b_de_ref,                 # drug_embed_net Linear (K-tiled weight)
    w_att_ref, b_att_ref,               # attention_net Linear
    w_fc_d_ref, w_fc_c_ref, b_fc_ref,   # fc, split into drug / cell halves
    w_c_ref, b_c_ref,                   # classifier[0] Linear (BN pre-folded)
    w2_ref, b2_ref,                     # fc2 as a (1, H1) row
    out_ref,
    demb_acc,                           # VMEM scratch: (tb, De) f32 accumulator
    *, compute_dtype,
):
    k = pl.program_id(1)
    nk = pl.num_programs(1)

    @pl.when(k == 0)
    def _init():
        demb_acc[...] = jnp.zeros_like(demb_acc)

    # Drug-embedding matmul, accumulated over the (possibly huge) K dimension.
    demb_acc[...] += jnp.dot(drug_x_ref[...], w_de_ref[...],
                             preferred_element_type=jnp.float32)

    @pl.when(k == nk - 1)
    def _finalize():
        # drug_embed_net epilogue: bias + ReLU
        drug_emb = jnp.maximum(demb_acc[...] + b_de_ref[...], 0.0)

        # attention_net: Linear + sigmoid -> per-feature weights on cell_x
        att = jnp.dot(np_ref[...], w_att_ref[...],
                      preferred_element_type=jnp.float32)
        c_w = jax.nn.sigmoid(att + b_att_ref[...])
        cell = c_w * cell_x_ref[...]

        # fc on cat(drug_emb, cell) == split matmul, then ReLU
        h = (jnp.dot(drug_emb.astype(compute_dtype), w_fc_d_ref[...],
                     preferred_element_type=jnp.float32)
             + jnp.dot(cell.astype(compute_dtype), w_fc_c_ref[...],
                       preferred_element_type=jnp.float32)
             + b_fc_ref[...])
        h = jnp.maximum(h, 0.0)

        # classifier[0]: Linear (eval-mode BatchNorm1d folded in) -> ReLU
        z = jnp.dot(h.astype(compute_dtype), w_c_ref[...],
                    preferred_element_type=jnp.float32) + b_c_ref[...]
        z = jnp.maximum(z, 0.0)
        # TODO(synk): training-mode Dropout / batch-statistics BN intentionally
        # omitted (eval semantics: Dropout is identity, BN uses running stats).

        # fc2 (N=1): VPU multiply + lane reduce instead of an MXU matmul.
        out_ref[...] = (jnp.sum(z * w2_ref[...], axis=-1, keepdims=True)
                        + b2_ref[...])


# ------------------------------ host helpers ------------------------------

def _round_up(x, m):
    return (x + m - 1) // m * m


def _vmem_capacity_bytes():
    try:
        return int(pltpu.get_tpu_info().vmem_capacity_bytes)
    except Exception:
        return 64 * 1024 * 1024   # conservative default (v7x per-core VMEM)


def prepare_np_drug_response_params(params, *, compute_dtype=jnp.bfloat16,
                                    k_tile=1024, bn_eps=1e-5):
    """One-time parameter preparation (pad + cast + BN fold), hoisted out of
    the forward path so per-call HBM traffic is activations + kernel only.

    params: [w_de, b_de, w_att, b_att, w_fc_d, w_fc_c, b_fc,
             w_c, b_c, bn_gamma, bn_beta, bn_mean, bn_var, w2, b2]
    """
    assert k_tile % 128 == 0, "k_tile must be a multiple of 128 (lane width)"
    (w_de, b_de, w_att, b_att, w_fc_d, w_fc_c, b_fc,
     w_c, b_c, bn_gamma, bn_beta, bn_mean, bn_var, w2, b2) = params
    cdt = compute_dtype

    drug_in, De = w_de.shape
    np_dim, cell_dim = w_att.shape
    H0 = w_fc_d.shape[1]
    H1 = w_c.shape[1]

    tk = min(k_tile, _round_up(drug_in, 128))
    Kp = _round_up(drug_in, tk)

    # Fold eval-mode BatchNorm (incl. running stats) into the classifier Linear.
    bn_scale = (bn_gamma.astype(f32) / jnp.sqrt(bn_var.astype(f32) + bn_eps))
    w_c_f = (w_c.astype(f32) * bn_scale).astype(cdt)
    b_c_f = ((b_c.astype(f32) - bn_mean.astype(f32)) * bn_scale
             + bn_beta.astype(f32))

    w_de_p = jnp.pad(w_de.astype(cdt), ((0, Kp - drug_in), (0, 0)))

    return {
        "meta": dict(drug_in=drug_in, De=De, np_dim=np_dim, cell_dim=cell_dim,
                     H0=H0, H1=H1, tk=tk, Kp=Kp, compute_dtype=cdt),
        "w_de": w_de_p,
        "b_de": b_de.astype(f32).reshape(1, De),
        "w_att": w_att.astype(cdt),
        "b_att": b_att.astype(f32).reshape(1, cell_dim),
        "w_fc_d": w_fc_d.astype(cdt),
        "w_fc_c": w_fc_c.astype(cdt),
        "b_fc": b_fc.astype(f32).reshape(1, H0),
        "w_c": w_c_f,
        "b_c": b_c_f.reshape(1, H1),
        "w2": w2.astype(f32).reshape(1, H1),   # (H1,1) column -> (1,H1) row
        "b2": b2.astype(f32).reshape(1, 1),
    }


# ------------------------------ forward wrapper ------------------------------

def np_drug_response_net(drug_x, cell_x, np_scores, prepared, *,
                         batch_tile=None, min_batch_tiles=1):
    """Forward pass. `prepared` comes from prepare_np_drug_response_params()."""
    meta = prepared["meta"]
    cdt = meta["compute_dtype"]
    De, np_dim, cell_dim = meta["De"], meta["np_dim"], meta["cell_dim"]
    H0, H1 = meta["H0"], meta["H1"]
    tk, Kp = meta["tk"], meta["Kp"]

    B = drug_x.shape[0]
    n_k = Kp // tk
    itemsize = jnp.dtype(cdt).itemsize

    # Per-spec buffer depths: constant-index blocks single-buffered; the
    # K-streamed pair gets a 3-deep pipeline when there are enough K steps.
    buf_wde = 1 if n_k == 1 else (3 if n_k >= 3 else 2)
    buf_dx = 3 if n_k >= 3 else 2

    # ---- batch tile: largest that fits the per-generation VMEM budget so the
    #      big (Kp, De) weight is streamed from HBM as few times as possible. ----
    vmem_cap = _vmem_capacity_bytes()
    vmem_budget = (vmem_cap * 3) // 4          # leave headroom for Mosaic

    resident = (buf_wde * tk * De * itemsize
                + (np_dim * cell_dim + De * H0 + cell_dim * H0
                   + H0 * H1) * itemsize                    # resident weights
                + (De + cell_dim + H0 + 2 * H1 + 1) * 4)    # biases / fc2 row
    per_row = (De * 4                                       # f32 accumulator
               + buf_dx * tk * itemsize                     # drug_x block(s)
               + 2 * cell_dim * 4 + 2 * np_dim * itemsize   # cell / np blocks
               + 2 * 128 * 4)                               # (lane-padded) out

    if batch_tile is None:
        tb_cap = max((vmem_budget - resident) // per_row, 16)
        tb_cap = max((tb_cap // 16) * 16, 16)
        tb = min(_round_up(B, 16), tb_cap)
        if min_batch_tiles > 1:   # e.g. 2 on v7x to engage both TensorCores
            tb = min(tb, _round_up(-(-B // min_batch_tiles), 16))
        tb = max(tb, 16)
    else:
        tb = max(_round_up(batch_tile, 16), 16)

    Bp = _round_up(B, tb)
    n_b = Bp // tb
    buf_act = 1 if n_b == 1 else 2

    # ---- per-call activation prep (small; big weights were prepared once) ----
    def pad_rows(a, cols=None):
        pr = Bp - a.shape[0]
        pc = 0 if cols is None else cols - a.shape[1]
        return jnp.pad(a, ((0, pr), (0, pc))) if (pr or pc) else a

    drug_x_p = pad_rows(drug_x.astype(cdt), Kp)
    cell_x_p = pad_rows(cell_x.astype(f32))
    np_p = pad_rows(np_scores.astype(cdt))

    inputs = [drug_x_p, cell_x_p, np_p,
              prepared["w_de"], prepared["b_de"],
              prepared["w_att"], prepared["b_att"],
              prepared["w_fc_d"], prepared["w_fc_c"], prepared["b_fc"],
              prepared["w_c"], prepared["b_c"],
              prepared["w2"], prepared["b2"]]

    spec_defs = [
        ((tb, tk),            lambda i, k: (i, k), buf_dx),
        ((tb, cell_dim),      lambda i, k: (i, 0), buf_act),
        ((tb, np_dim),        lambda i, k: (i, 0), buf_act),
        ((tk, De),            lambda i, k: (k, 0), buf_wde),
        ((1, De),             lambda i, k: (0, 0), 1),
        ((np_dim, cell_dim),  lambda i, k: (0, 0), 1),
        ((1, cell_dim),       lambda i, k: (0, 0), 1),
        ((De, H0),            lambda i, k: (0, 0), 1),
        ((cell_dim, H0),      lambda i, k: (0, 0), 1),
        ((1, H0),             lambda i, k: (0, 0), 1),
        ((H0, H1),            lambda i, k: (0, 0), 1),
        ((1, H1),             lambda i, k: (0, 0), 1),
        ((1, H1),             lambda i, k: (0, 0), 1),
        ((1, 1),              lambda i, k: (0, 0), 1),
    ]

    def build_specs(use_buffered):
        specs = []
        for shape, imap, nbuf in spec_defs:
            if use_buffered and hasattr(pl, "Buffered"):
                try:
                    specs.append(pl.BlockSpec(shape, imap,
                                              pipeline_mode=pl.Buffered(nbuf)))
                    continue
                except TypeError:
                    pass
            specs.append(pl.BlockSpec(shape, imap))
        return specs

    out_spec = pl.BlockSpec((tb, 1), lambda i, k: (i, 0))

    # ---- VMEM limit: actual footprint (not doubled) + headroom ----
    needed = resident + tb * per_row
    vmem_limit = int(max(min(vmem_cap - (8 << 20),
                             max(needed + (4 << 20), 32 << 20)),
                         16 << 20))

    # ---- cost estimate: HBM-bound; count w_de re-reads per batch tile ----
    flops = (2 * Bp * Kp * De
             + 2 * Bp * (np_dim * cell_dim + De * H0 + cell_dim * H0
                         + H0 * H1 + H1))
    bytes_accessed = (Bp * (Kp * itemsize + cell_dim * 4 + np_dim * itemsize)
                      + n_b * Kp * De * itemsize
                      + (np_dim * cell_dim + De * H0 + cell_dim * H0
                         + H0 * H1) * itemsize
                      + (De + cell_dim + H0 + 2 * H1 + 1) * 4
                      + Bp * 4)
    cost = pl.CostEstimate(flops=int(flops),
                           transcendentals=int(Bp * cell_dim),
                           bytes_accessed=int(bytes_accessed))

    kernel = functools.partial(_np_drug_response_kernel, compute_dtype=cdt)

    def call(in_specs):
        return pl.pallas_call(
            kernel,
            out_shape=jax.ShapeDtypeStruct((Bp, 1), f32),
            grid_spec=pltpu.PrefetchScalarGridSpec(
                num_scalar_prefetch=0,
                grid=(n_b, n_k),
                in_specs=in_specs,
                out_specs=out_spec,
                scratch_shapes=[pltpu.VMEM((tb, De), f32)],
            ),
            compiler_params=pltpu.CompilerParams(
                dimension_semantics=("parallel", "arbitrary"),
                vmem_limit_bytes=vmem_limit,
            ),
            cost_estimate=cost,
        )(*inputs)

    try:
        out = call(build_specs(True))
    except Exception:
        # pipeline_mode / explicit buffer counts unsupported: plain BlockSpecs.
        out = call(build_specs(False))
    return out[:B]


# --------------------- parameter construction (JAX glue) ---------------------

def init_params(key, drug_in, drug_emb, cell_dim, np_dim, fc_hid):
    ks = jax.random.split(key, 14)
    u = lambda k, shape, s: jax.random.uniform(k, shape, jnp.float32, -s, s)

    w_de = u(ks[0], (drug_in, drug_emb), 1.0 / jnp.sqrt(drug_in))
    b_de = u(ks[1], (1, drug_emb), 1.0 / jnp.sqrt(drug_in))
    w_att = u(ks[2], (np_dim, cell_dim), 1.0 / jnp.sqrt(np_dim))
    b_att = u(ks[3], (1, cell_dim), 1.0 / jnp.sqrt(np_dim))
    fc_in = drug_emb + cell_dim
    w_fc_d = u(ks[4], (drug_emb, fc_hid[0]), 1.0 / jnp.sqrt(fc_in))
    w_fc_c = u(ks[5], (cell_dim, fc_hid[0]), 1.0 / jnp.sqrt(fc_in))
    b_fc = u(ks[6], (1, fc_hid[0]), 1.0 / jnp.sqrt(fc_in))
    xav = jnp.sqrt(6.0 / (fc_hid[0] + fc_hid[1]))
    w_c = u(ks[7], (fc_hid[0], fc_hid[1]), xav)
    b_c = u(ks[8], (1, fc_hid[1]), 1.0 / jnp.sqrt(fc_hid[0]))
    # BatchNorm1d(fc_hid[1]) eval-mode affine + non-trivial running stats.
    bn_gamma = 1.0 + 0.1 * jax.random.normal(ks[9], (1, fc_hid[1]), jnp.float32)
    bn_beta = 0.1 * jax.random.normal(ks[10], (1, fc_hid[1]), jnp.float32)
    bn_mean = 0.1 * jax.random.normal(ks[11], (1, fc_hid[1]), jnp.float32)
    bn_var = 1.0 + 0.2 * jnp.abs(jax.random.normal(ks[12], (1, fc_hid[1]),
                                                   jnp.float32))
    w2 = u(ks[13], (fc_hid[1], 1), 1.0 / jnp.sqrt(fc_hid[1]))
    b2 = jnp.zeros((1, 1), jnp.float32)

    return [w_de, b_de, w_att, b_att, w_fc_d, w_fc_c, b_fc,
            w_c, b_c, bn_gamma, bn_beta, bn_mean, bn_var, w2, b2]


def reference_forward(drug_x, cell_x, np_scores, p, bn_eps=1e-5):
    (w_de, b_de, w_att, b_att, w_fc_d, w_fc_c, b_fc,
     w_c, b_c, bn_gamma, bn_beta, bn_mean, bn_var, w2, b2) = p
    drug_emb = jax.nn.relu(drug_x @ w_de + b_de)
    c_w = jax.nn.sigmoid(np_scores @ w_att + b_att)
    cell = c_w * cell_x
    h = jax.nn.relu(drug_emb @ w_fc_d + cell @ w_fc_c + b_fc)
    z = (h @ w_c + b_c - bn_mean) / jnp.sqrt(bn_var + bn_eps) * bn_gamma + bn_beta
    z = jax.nn.relu(z)          # eval-mode Dropout == identity
    return z @ w2 + b2


if __name__ == "__main__":
    # Small shapes consistent with the module (scaled down from 18115/1024/512).
    B, DRUG_IN, DRUG_EMB, CELL_DIM, NP_DIM = 8, 32, 128, 256, 64
    FC_HID = [128, 128]

    key = jax.random.PRNGKey(0)
    k_d, k_c, k_n, k_p = jax.random.split(key, 4)
    drug_x = jax.random.normal(k_d, (B, DRUG_IN), jnp.float32)
    cell_x = jax.random.normal(k_c, (B, CELL_DIM), jnp.float32)
    np_scores = jax.random.normal(k_n, (B, NP_DIM), jnp.float32)

    params = init_params(k_p, DRUG_IN, DRUG_EMB, CELL_DIM, NP_DIM, FC_HID)

    # One-time weight prep (pad / cast / BN fold) hoisted out of the forward.
    prepared = prepare_np_drug_response_params(params)

    out = np_drug_response_net(drug_x, cell_x, np_scores, prepared)
    out = jax.block_until_ready(out)

    ref = reference_forward(drug_x, cell_x, np_scores, params)
    assert out.shape == (B, 1)
    # bf16 matmul operands with f32 accumulation -> loosened tolerance vs f32 ref.
    assert jnp.allclose(out, ref, rtol=5e-2, atol=5e-2), "mismatch vs JAX reference"

    print("KERNEL_OK")
</pallas_src>

<mosaic_0001>
module attributes {stable_mosaic.version = 11 : i64} {
  func.func @_np_drug_response_kernel(%arg0: i32, %arg1: i32, %arg2: memref<16x128xbf16, #tpu.memory_space<vmem>>, %arg3: memref<16x256xf32, #tpu.memory_space<vmem>>, %arg4: memref<16x64xbf16, #tpu.memory_space<vmem>>, %arg5: memref<128x128xbf16, #tpu.memory_space<vmem>>, %arg6: memref<1x128xf32, #tpu.memory_space<vmem>>, %arg7: memref<64x256xbf16, #tpu.memory_space<vmem>>, %arg8: memref<1x256xf32, #tpu.memory_space<vmem>>, %arg9: memref<128x128xbf16, #tpu.memory_space<vmem>>, %arg10: memref<256x128xbf16, #tpu.memory_space<vmem>>, %arg11: memref<1x128xf32, #tpu.memory_space<vmem>>, %arg12: memref<128x128xbf16, #tpu.memory_space<vmem>>, %arg13: memref<1x128xf32, #tpu.memory_space<vmem>>, %arg14: memref<1x128xf32, #tpu.memory_space<vmem>>, %arg15: memref<1x1xf32, #tpu.memory_space<vmem>>, %arg16: memref<16x1xf32, #tpu.memory_space<vmem>>, %arg17: memref<16x128xf32, #tpu.memory_space<vmem>>) attributes {dimension_semantics = [#tpu.dimension_semantics<parallel>, #tpu.dimension_semantics<arbitrary>], iteration_bounds = array<i64: 1, 1>, scalar_prefetch = 0 : i64, scratch_operands = 1 : i64, tpu.core_type = #tpu.core_type<tc>, window_params = [{pipeline_mode = #tpu.pipeline_mode<double_buffered>, transform_indices = @transform_0, window_bounds = array<i64: 16, 128>}, {pipeline_mode = #tpu.pipeline_mode<synchronous>, transform_indices = @transform_1, window_bounds = array<i64: 16, 256>}, {pipeline_mode = #tpu.pipeline_mode<synchronous>, transform_indices = @transform_2, window_bounds = array<i64: 16, 64>}, {pipeline_mode = #tpu.pipeline_mode<synchronous>, transform_indices = @transform_3, window_bounds = array<i64: 128, 128>}, {pipeline_mode = #tpu.pipeline_mode<synchronous>, transform_indices = @transform_4, window_bounds = array<i64: 1, 128>}, {pipeline_mode = #tpu.pipeline_mode<synchronous>, transform_indices = @transform_5, window_bounds = array<i64: 64, 256>}, {pipeline_mode = #tpu.pipeline_mode<synchronous>, transform_indices = @transform_6, window_bounds = array<i64: 1, 256>}, {pipeline_mode = #tpu.pipeline_mode<synchronous>, transform_indices = @transform_7, window_bounds = array<i64: 128, 128>}, {pipeline_mode = #tpu.pipeline_mode<synchronous>, transform_indices = @transform_8, window_bounds = array<i64: 256, 128>}, {pipeline_mode = #tpu.pipeline_mode<synchronous>, transform_indices = @transform_9, window_bounds = array<i64: 1, 128>}, {pipeline_mode = #tpu.pipeline_mode<synchronous>, transform_indices = @transform_10, window_bounds = array<i64: 128, 128>}, {pipeline_mode = #tpu.pipeline_mode<synchronous>, transform_indices = @transform_11, window_bounds = array<i64: 1, 128>}, {pipeline_mode = #tpu.pipeline_mode<synchronous>, transform_indices = @transform_12, window_bounds = array<i64: 1, 128>}, {pipeline_mode = #tpu.pipeline_mode<synchronous>, transform_indices = @transform_13, window_bounds = array<i64: 1, 1>}, {transform_indices = @transform_14, window_bounds = array<i64: 16, 1>}]} {
    %c0_i32 = arith.constant 0 : i32
    %0 = arith.cmpi eq, %arg1, %c0_i32 : i32
    %1 = arith.extui %0 : i1 to i32
    %c0_i32_0 = arith.constant 0 : i32
    %2 = arith.cmpi ne, %1, %c0_i32_0 : i32
    scf.if %2 {
      %cst_10 = arith.constant 0.000000e+00 : f32
      %12 = vector.broadcast %cst_10 : f32 to vector<16x128xf32>
      %c0_11 = arith.constant 0 : index
      %c0_12 = arith.constant 0 : index
      %13 = vector.load %arg17[%c0_11, %c0_12] : memref<16x128xf32, #tpu.memory_space<vmem>>, vector<16x128xf32>
      tpu.vector_store %arg17[%c0_11, %c0_12], %12 {strides = array<i32>} : memref<16x128xf32, #tpu.memory_space<vmem>>, vector<16x128xf32>,
    } else {
    }
    %c0 = arith.constant 0 : index
    %c0_1 = arith.constant 0 : index
    %3 = vector.load %arg17[%c0, %c0_1] : memref<16x128xf32, #tpu.memory_space<vmem>>, vector<16x128xf32>
    %c0_2 = arith.constant 0 : index
    %c0_3 = arith.constant 0 : index
    %4 = vector.load %arg2[%c0_2, %c0_3] : memref<16x128xbf16, #tpu.memory_space<vmem>>, vector<16x128xbf16>
    %c0_4 = arith.constant 0 : index
    %c0_5 = arith.constant 0 : index
    %5 = vector.load %arg5[%c0_4, %c0_5] : memref<128x128xbf16, #tpu.memory_space<vmem>>, vector<128x128xbf16>
    %cst = arith.constant dense<0.000000e+00> : vector<16x128xf32>
    %6 = tpu.matmul %4, %5, %cst {dimension_numbers = #tpu.dot_dimension_numbers<[1], [0], [0], [1], [0, 0, 1, 1], [], []>} : vector<16x128xbf16>, vector<128x128xbf16>, vector<16x128xf32> -> vector<16x128xf32>
    %7 = arith.addf %3, %6 : vector<16x128xf32>
    %c0_6 = arith.constant 0 : index
    %c0_7 = arith.constant 0 : index
    %8 = vector.load %arg17[%c0_6, %c0_7] : memref<16x128xf32, #tpu.memory_space<vmem>>, vector<16x128xf32>
    tpu.vector_store %arg17[%c0_6, %c0_7], %7 {strides = array<i32>} : memref<16x128xf32, #tpu.memory_space<vmem>>, vector<16x128xf32>,
    %c0_i32_8 = arith.constant 0 : i32
    %9 = arith.cmpi eq, %arg1, %c0_i32_8 : i32
    %10 = arith.extui %9 : i1 to i32
    %c0_i32_9 = arith.constant 0 : i32
    %11 = arith.cmpi ne, %10, %c0_i32_9 : i32
    scf.if %11 {
      %c0_10 = arith.constant 0 : index
      %c0_11 = arith.constant 0 : index
      %12 = vector.load %arg17[%c0_10, %c0_11] : memref<16x128xf32, #tpu.memory_space<vmem>>, vector<16x128xf32>
      %c0_12 = arith.constant 0 : index
      %c0_13 = arith.constant 0 : index
      %13 = vector.load %arg6[%c0_12, %c0_13] : memref<1x128xf32, #tpu.memory_space<vmem>>, vector<1x128xf32>
      %14 = vector.broadcast %13 : vector<1x128xf32> to vector<16x128xf32>
      %15 = arith.addf %12, %14 : vector<16x128xf32>
      %cst_14 = arith.constant 0.000000e+00 : f32
      %16 = vector.broadcast %cst_14 : f32 to vector<16x128xf32>
      %17 = arith.maximumf %15, %16 : vector<16x128xf32>
      %c0_15 = arith.constant 0 : index
      %c0_16 = arith.constant 0 : index
      %18 = vector.load %arg4[%c0_15, %c0_16] : memref<16x64xbf16, #tpu.memory_space<vmem>>, vector<16x64xbf16>
      %c0_17 = arith.constant 0 : index
      %c0_18 = arith.constant 0 : index
      %19 = vector.load %arg7[%c0_17, %c0_18] : memref<64x256xbf16, #tpu.memory_space<vmem>>, vector<64x256xbf16>
      %cst_19 = arith.constant dense<0.000000e+00> : vector<16x256xf32>
      %20 = tpu.matmul %18, %19, %cst_19 {dimension_numbers = #tpu.dot_dimension_numbers<[1], [0], [0], [1], [0, 0, 1, 1], [], []>} : vector<16x64xbf16>, vector<64x256xbf16>, vector<16x256xf32> -> vector<16x256xf32>
      %c0_20 = arith.constant 0 : index
      %c0_21 = arith.constant 0 : index
      %21 = vector.load %arg8[%c0_20, %c0_21] : memref<1x256xf32, #tpu.memory_space<vmem>>, vector<1x256xf32>
      %22 = vector.broadcast %21 : vector<1x256xf32> to vector<16x256xf32>
      %23 = arith.addf %20, %22 : vector<16x256xf32>
      %24 = arith.negf %23 : vector<16x256xf32>
      %25 = math.exp %24 : vector<16x256xf32>
      %cst_22 = arith.constant 1.000000e+00 : f32
      %26 = vector.broadcast %cst_22 : f32 to vector<16x256xf32>
      %27 = arith.addf %26, %25 : vector<16x256xf32>
      %28 = arith.divf %26, %27 : vector<16x256xf32>
      %c0_23 = arith.constant 0 : index
      %c0_24 = arith.constant 0 : index
      %29 = vector.load %arg3[%c0_23, %c0_24] : memref<16x256xf32, #tpu.memory_space<vmem>>, vector<16x256xf32>
      %30 = arith.mulf %28, %29 : vector<16x256xf32>
      %31 = arith.truncf %17 : vector<16x128xf32> to vector<16x128xbf16>
      %c0_25 = arith.constant 0 : index
      %c0_26 = arith.constant 0 : index
      %32 = vector.load %arg9[%c0_25, %c0_26] : memref<128x128xbf16, #tpu.memory_space<vmem>>, vector<128x128xbf16>
      %cst_27 = arith.constant dense<0.000000e+00> : vector<16x128xf32>
      %33 = tpu.matmul %31, %32, %cst_27 {dimension_numbers = #tpu.dot_dimension_numbers<[1], [0], [0], [1], [0, 0, 1, 1], [], []>} : vector<16x128xbf16>, vector<128x128xbf16>, vector<16x128xf32> -> vector<16x128xf32>
      %34 = arith.truncf %30 : vector<16x256xf32> to vector<16x256xbf16>
      %c0_28 = arith.constant 0 : index
      %c0_29 = arith.constant 0 : index
      %35 = vector.load %arg10[%c0_28, %c0_29] : memref<256x128xbf16, #tpu.memory_space<vmem>>, vector<256x128xbf16>
      %cst_30 = arith.constant dense<0.000000e+00> : vector<16x128xf32>
      %36 = tpu.matmul %34, %35, %cst_30 {dimension_numbers = #tpu.dot_dimension_numbers<[1], [0], [0], [1], [0, 0, 1, 1], [], []>} : vector<16x256xbf16>, vector<256x128xbf16>, vector<16x128xf32> -> vector<16x128xf32>
      %37 = arith.addf %33, %36 : vector<16x128xf32>
      %c0_31 = arith.constant 0 : index
      %c0_32 = arith.constant 0 : index
      %38 = vector.load %arg11[%c0_31, %c0_32] : memref<1x128xf32, #tpu.memory_space<vmem>>, vector<1x128xf32>
      %39 = vector.broadcast %38 : vector<1x128xf32> to vector<16x128xf32>
      %40 = arith.addf %37, %39 : vector<16x128xf32>
      %cst_33 = arith.constant 0.000000e+00 : f32
      %41 = vector.broadcast %cst_33 : f32 to vector<16x128xf32>
      %42 = arith.maximumf %40, %41 : vector<16x128xf32>
      %43 = arith.truncf %42 : vector<16x128xf32> to vector<16x128xbf16>
      %c0_34 = arith.constant 0 : index
      %c0_35 = arith.constant 0 : index
      %44 = vector.load %arg12[%c0_34, %c0_35] : memref<128x128xbf16, #tpu.memory_space<vmem>>, vector<128x128xbf16>
      %cst_36 = arith.constant dense<0.000000e+00> : vector<16x128xf32>
      %45 = tpu.matmul %43, %44, %cst_36 {dimension_numbers = #tpu.dot_dimension_numbers<[1], [0], [0], [1], [0, 0, 1, 1], [], []>} : vector<16x128xbf16>, vector<128x128xbf16>, vector<16x128xf32> -> vector<16x128xf32>
      %c0_37 = arith.constant 0 : index
      %c0_38 = arith.constant 0 : index
      %46 = vector.load %arg13[%c0_37, %c0_38] : memref<1x128xf32, #tpu.memory_space<vmem>>, vector<1x128xf32>
      %47 = vector.broadcast %46 : vector<1x128xf32> to vector<16x128xf32>
      %48 = arith.addf %45, %47 : vector<16x128xf32>
      %cst_39 = arith.constant 0.000000e+00 : f32
      %49 = vector.broadcast %cst_39 : f32 to vector<16x128xf32>
      %50 = arith.maximumf %48, %49 : vector<16x128xf32>
      %c0_40 = arith.constant 0 : index
      %c0_41 = arith.constant 0 : index
      %51 = vector.load %arg14[%c0_40, %c0_41] : memref<1x128xf32, #tpu.memory_space<vmem>>, vector<1x128xf32>
      %52 = vector.broadcast %51 : vector<1x128xf32> to vector<16x128xf32>
      %53 = arith.mulf %50, %52 : vector<16x128xf32>
      %cst_42 = arith.constant dense<0.000000e+00> : vector<16xf32>
      %54 = vector.multi_reduction <add>, %53, %cst_42 [1] : vector<16x128xf32> to vector<16xf32>
      %55 = vector.shape_cast %54 : vector<16xf32> to vector<16x1xf32>
      %c0_43 = arith.constant 0 : index
      %c0_44 = arith.constant 0 : index
      %56 = vector.load %arg15[%c0_43, %c0_44] : memref<1x1xf32, #tpu.memory_space<vmem>>, vector<1x1xf32>
      %57 = vector.broadcast %56 : vector<1x1xf32> to vector<16x1xf32>
      %58 = arith.addf %55, %57 : vector<16x1xf32>
      %c0_45 = arith.constant 0 : index
      %c0_46 = arith.constant 0 : index
      %59 = vector.load %arg16[%c0_45, %c0_46] : memref<16x1xf32, #tpu.memory_space<vmem>>, vector<16x1xf32>
      tpu.vector_store %arg16[%c0_45, %c0_46], %58 {strides = array<i32>} : memref<16x1xf32, #tpu.memory_space<vmem>>, vector<16x1xf32>,
    } else {
    }
    return
  }
  func.func @transform_0(%arg0: i32, %arg1: i32) -> (i32, i32) {
    %c0_i32 = arith.constant 0 : i32
    return %arg0, %arg1 : i32, i32
  }
  func.func @transform_1(%arg0: i32, %arg1: i32) -> (i32, i32) {
    %c0_i32 = arith.constant 0 : i32
    %c0_i32_0 = arith.constant 0 : i32
    return %arg0, %c0_i32 : i32, i32
  }
  func.func @transform_2(%arg0: i32, %arg1: i32) -> (i32, i32) {
    %c0_i32 = arith.constant 0 : i32
    %c0_i32_0 = arith.constant 0 : i32
    return %arg0, %c0_i32 : i32, i32
  }
  func.func @transform_3(%arg0: i32, %arg1: i32) -> (i32, i32) {
    %c0_i32 = arith.constant 0 : i32
    %c0_i32_0 = arith.constant 0 : i32
    return %arg1, %c0_i32 : i32, i32
  }
  func.func @transform_4(%arg0: i32, %arg1: i32) -> (i32, i32) {
    %c0_i32 = arith.constant 0 : i32
    %c0_i32_0 = arith.constant 0 : i32
    %c0_i32_1 = arith.constant 0 : i32
    return %c0_i32, %c0_i32_0 : i32, i32
  }
  func.func @transform_5(%arg0: i32, %arg1: i32) -> (i32, i32) {
    %c0_i32 = arith.constant 0 : i32
    %c0_i32_0 = arith.constant 0 : i32
    %c0_i32_1 = arith.constant 0 : i32
    return %c0_i32, %c0_i32_0 : i32, i32
  }
  func.func @transform_6(%arg0: i32, %arg1: i32) -> (i32, i32) {
    %c0_i32 = arith.constant 0 : i32
    %c0_i32_0 = arith.constant 0 : i32
    %c0_i32_1 = arith.constant 0 : i32
    return %c0_i32, %c0_i32_0 : i32, i32
  }
  func.func @transform_7(%arg0: i32, %arg1: i32) -> (i32, i32) {
    %c0_i32 = arith.constant 0 : i32
    %c0_i32_0 = arith.constant 0 : i32
    %c0_i32_1 = arith.constant 0 : i32
    return %c0_i32, %c0_i32_0 : i32, i32
  }
  func.func @transform_8(%arg0: i32, %arg1: i32) -> (i32, i32) {
    %c0_i32 = arith.constant 0 : i32
    %c0_i32_0 = arith.constant 0 : i32
    %c0_i32_1 = arith.constant 0 : i32
    return %c0_i32, %c0_i32_0 : i32, i32
  }
  func.func @transform_9(%arg0: i32, %arg1: i32) -> (i32, i32) {
    %c0_i32 = arith.constant 0 : i32
    %c0_i32_0 = arith.constant 0 : i32
    %c0_i32_1 = arith.constant 0 : i32
    return %c0_i32, %c0_i32_0 : i32, i32
  }
  func.func @transform_10(%arg0: i32, %arg1: i32) -> (i32, i32) {
    %c0_i32 = arith.constant 0 : i32
    %c0_i32_0 = arith.constant 0 : i32
    %c0_i32_1 = arith.constant 0 : i32
    return %c0_i32, %c0_i32_0 : i32, i32
  }
  func.func @transform_11(%arg0: i32, %arg1: i32) -> (i32, i32) {
    %c0_i32 = arith.constant 0 : i32
    %c0_i32_0 = arith.constant 0 : i32
    %c0_i32_1 = arith.constant 0 : i32
    return %c0_i32, %c0_i32_0 : i32, i32
  }
  func.func @transform_12(%arg0: i32, %arg1: i32) -> (i32, i32) {
    %c0_i32 = arith.constant 0 : i32
    %c0_i32_0 = arith.constant 0 : i32
    %c0_i32_1 = arith.constant 0 : i32
    return %c0_i32, %c0_i32_0 : i32, i32
  }
  func.func @transform_13(%arg0: i32, %arg1: i32) -> (i32, i32) {
    %c0_i32 = arith.constant 0 : i32
    %c0_i32_0 = arith.constant 0 : i32
    %c0_i32_1 = arith.constant 0 : i32
    return %c0_i32, %c0_i32_0 : i32, i32
  }
  func.func @transform_14(%arg0: i32, %arg1: i32) -> (i32, i32) {
    %c0_i32 = arith.constant 0 : i32
    %c0_i32_0 = arith.constant 0 : i32
    return %arg0, %c0_i32 : i32, i32
  }
}

module attributes {stable_mosaic.version = 11 : i64} {
  func.func @_np_drug_response_kernel(%arg0: i32, %arg1: i32, %arg2: memref<16x128xbf16, #tpu.memory_space<vmem>>, %arg3: memref<16x256xf32, #tpu.memory_space<vmem>>, %arg4: memref<16x64xbf16, #tpu.memory_space<vmem>>, %arg5: memref<128x128xbf16, #tpu.memory_space<vmem>>, %arg6: memref<1x128xf32, #tpu.memory_space<vmem>>, %arg7: memref<64x256xbf16, #tpu.memory_space<vmem>>, %arg8: memref<1x256xf32, #tpu.memory_space<vmem>>, %arg9: memref<128x128xbf16, #tpu.memory_space<vmem>>, %arg10: memref<256x128xbf16, #tpu.memory_space<vmem>>, %arg11: memref<1x128xf32, #tpu.memory_space<vmem>>, %arg12: memref<128x128xbf16, #tpu.memory_space<vmem>>, %arg13: memref<1x128xf32, #tpu.memory_space<vmem>>, %arg14: memref<1x128xf32, #tpu.memory_space<vmem>>, %arg15: memref<1x1xf32, #tpu.memory_space<vmem>>, %arg16: memref<16x1xf32, #tpu.memory_space<vmem>>, %arg17: memref<16x128xf32, #tpu.memory_space<vmem>>) attributes {dimension_semantics = [#tpu.dimension_semantics<parallel>, #tpu.dimension_semantics<arbitrary>], iteration_bounds = array<i64: 1, 1>, scalar_prefetch = 0 : i64, scratch_operands = 1 : i64, tpu.core_type = #tpu.core_type<tc>, window_params = [{transform_indices = @transform_0, window_bounds = array<i64: 16, 128>}, {transform_indices = @transform_1, window_bounds = array<i64: 16, 256>}, {transform_indices = @transform_2, window_bounds = array<i64: 16, 64>}, {transform_indices = @transform_3, window_bounds = array<i64: 128, 128>}, {pipeline_mode = #tpu.pipeline_mode<synchronous>, transform_indices = @transform_4, window_bounds = array<i64: 1, 128>}, {pipeline_mode = #tpu.pipeline_mode<synchronous>, transform_indices = @transform_5, window_bounds = array<i64: 64, 256>}, {pipeline_mode = #tpu.pipeline_mode<synchronous>, transform_indices = @transform_6, window_bounds = array<i64: 1, 256>}, {pipeline_mode = #tpu.pipeline_mode<synchronous>, transform_indices = @transform_7, window_bounds = array<i64: 128, 128>}, {pipeline_mode = #tpu.pipeline_mode<synchronous>, transform_indices = @transform_8, window_bounds = array<i64: 256, 128>}, {pipeline_mode = #tpu.pipeline_mode<synchronous>, transform_indices = @transform_9, window_bounds = array<i64: 1, 128>}, {pipeline_mode = #tpu.pipeline_mode<synchronous>, transform_indices = @transform_10, window_bounds = array<i64: 128, 128>}, {pipeline_mode = #tpu.pipeline_mode<synchronous>, transform_indices = @transform_11, window_bounds = array<i64: 1, 128>}, {pipeline_mode = #tpu.pipeline_mode<synchronous>, transform_indices = @transform_12, window_bounds = array<i64: 1, 128>}, {pipeline_mode = #tpu.pipeline_mode<synchronous>, transform_indices = @transform_13, window_bounds = array<i64: 1, 1>}, {transform_indices = @transform_14, window_bounds = array<i64: 16, 1>}]} {
    %c0_i32 = arith.constant 0 : i32
    %0 = arith.cmpi eq, %arg1, %c0_i32 : i32
    %1 = arith.extui %0 : i1 to i32
    %c0_i32_0 = arith.constant 0 : i32
    %2 = arith.cmpi ne, %1, %c0_i32_0 : i32
    scf.if %2 {
      %cst_10 = arith.constant 0.000000e+00 : f32
      %12 = vector.broadcast %cst_10 : f32 to vector<16x128xf32>
      %c0_11 = arith.constant 0 : index
      %c0_12 = arith.constant 0 : index
      %13 = vector.load %arg17[%c0_11, %c0_12] : memref<16x128xf32, #tpu.memory_space<vmem>>, vector<16x128xf32>
      tpu.vector_store %arg17[%c0_11, %c0_12], %12 {strides = array<i32>} : memref<16x128xf32, #tpu.memory_space<vmem>>, vector<16x128xf32>,
    } else {
    }
    %c0 = arith.constant 0 : index
    %c0_1 = arith.constant 0 : index
    %3 = vector.load %arg17[%c0, %c0_1] : memref<16x128xf32, #tpu.memory_space<vmem>>, vector<16x128xf32>
    %c0_2 = arith.constant 0 : index
    %c0_3 = arith.constant 0 : index
    %4 = vector.load %arg2[%c0_2, %c0_3] : memref<16x128xbf16, #tpu.memory_space<vmem>>, vector<16x128xbf16>
    %c0_4 = arith.constant 0 : index
    %c0_5 = arith.constant 0 : index
    %5 = vector.load %arg5[%c0_4, %c0_5] : memref<128x128xbf16, #tpu.memory_space<vmem>>, vector<128x128xbf16>
    %cst = arith.constant dense<0.000000e+00> : vector<16x128xf32>
    %6 = tpu.matmul %4, %5, %cst {dimension_numbers = #tpu.dot_dimension_numbers<[1], [0], [0], [1], [0, 0, 1, 1], [], []>} : vector<16x128xbf16>, vector<128x128xbf16>, vector<16x128xf32> -> vector<16x128xf32>
    %7 = arith.addf %3, %6 : vector<16x128xf32>
    %c0_6 = arith.constant 0 : index
    %c0_7 = arith.constant 0 : index
    %8 = vector.load %arg17[%c0_6, %c0_7] : memref<16x128xf32, #tpu.memory_space<vmem>>, vector<16x128xf32>
    tpu.vector_store %arg17[%c0_6, %c0_7], %7 {strides = array<i32>} : memref<16x128xf32, #tpu.memory_space<vmem>>, vector<16x128xf32>,
    %c0_i32_8 = arith.constant 0 : i32
    %9 = arith.cmpi eq, %arg1, %c0_i32_8 : i32
    %10 = arith.extui %9 : i1 to i32
    %c0_i32_9 = arith.constant 0 : i32
    %11 = arith.cmpi ne, %10, %c0_i32_9 : i32
    scf.if %11 {
      %c0_10 = arith.constant 0 : index
      %c0_11 = arith.constant 0 : index
      %12 = vector.load %arg17[%c0_10, %c0_11] : memref<16x128xf32, #tpu.memory_space<vmem>>, vector<16x128xf32>
      %c0_12 = arith.constant 0 : index
      %c0_13 = arith.constant 0 : index
      %13 = vector.load %arg6[%c0_12, %c0_13] : memref<1x128xf32, #tpu.memory_space<vmem>>, vector<1x128xf32>
      %14 = vector.broadcast %13 : vector<1x128xf32> to vector<16x128xf32>
      %15 = arith.addf %12, %14 : vector<16x128xf32>
      %cst_14 = arith.constant 0.000000e+00 : f32
      %16 = vector.broadcast %cst_14 : f32 to vector<16x128xf32>
      %17 = arith.maximumf %15, %16 : vector<16x128xf32>
      %c0_15 = arith.constant 0 : index
      %c0_16 = arith.constant 0 : index
      %18 = vector.load %arg4[%c0_15, %c0_16] : memref<16x64xbf16, #tpu.memory_space<vmem>>, vector<16x64xbf16>
      %c0_17 = arith.constant 0 : index
      %c0_18 = arith.constant 0 : index
      %19 = vector.load %arg7[%c0_17, %c0_18] : memref<64x256xbf16, #tpu.memory_space<vmem>>, vector<64x256xbf16>
      %cst_19 = arith.constant dense<0.000000e+00> : vector<16x256xf32>
      %20 = tpu.matmul %18, %19, %cst_19 {dimension_numbers = #tpu.dot_dimension_numbers<[1], [0], [0], [1], [0, 0, 1, 1], [], []>} : vector<16x64xbf16>, vector<64x256xbf16>, vector<16x256xf32> -> vector<16x256xf32>
      %c0_20 = arith.constant 0 : index
      %c0_21 = arith.constant 0 : index
      %21 = vector.load %arg8[%c0_20, %c0_21] : memref<1x256xf32, #tpu.memory_space<vmem>>, vector<1x256xf32>
      %22 = vector.broadcast %21 : vector<1x256xf32> to vector<16x256xf32>
      %23 = arith.addf %20, %22 : vector<16x256xf32>
      %24 = arith.negf %23 : vector<16x256xf32>
      %25 = math.exp %24 : vector<16x256xf32>
      %cst_22 = arith.constant 1.000000e+00 : f32
      %26 = vector.broadcast %cst_22 : f32 to vector<16x256xf32>
      %27 = arith.addf %26, %25 : vector<16x256xf32>
      %28 = arith.divf %26, %27 : vector<16x256xf32>
      %c0_23 = arith.constant 0 : index
      %c0_24 = arith.constant 0 : index
      %29 = vector.load %arg3[%c0_23, %c0_24] : memref<16x256xf32, #tpu.memory_space<vmem>>, vector<16x256xf32>
      %30 = arith.mulf %28, %29 : vector<16x256xf32>
      %31 = arith.truncf %17 : vector<16x128xf32> to vector<16x128xbf16>
      %c0_25 = arith.constant 0 : index
      %c0_26 = arith.constant 0 : index
      %32 = vector.load %arg9[%c0_25, %c0_26] : memref<128x128xbf16, #tpu.memory_space<vmem>>, vector<128x128xbf16>
      %cst_27 = arith.constant dense<0.000000e+00> : vector<16x128xf32>
      %33 = tpu.matmul %31, %32, %cst_27 {dimension_numbers = #tpu.dot_dimension_numbers<[1], [0], [0], [1], [0, 0, 1, 1], [], []>} : vector<16x128xbf16>, vector<128x128xbf16>, vector<16x128xf32> -> vector<16x128xf32>
      %34 = arith.truncf %30 : vector<16x256xf32> to vector<16x256xbf16>
      %c0_28 = arith.constant 0 : index
      %c0_29 = arith.constant 0 : index
      %35 = vector.load %arg10[%c0_28, %c0_29] : memref<256x128xbf16, #tpu.memory_space<vmem>>, vector<256x128xbf16>
      %cst_30 = arith.constant dense<0.000000e+00> : vector<16x128xf32>
      %36 = tpu.matmul %34, %35, %cst_30 {dimension_numbers = #tpu.dot_dimension_numbers<[1], [0], [0], [1], [0, 0, 1, 1], [], []>} : vector<16x256xbf16>, vector<256x128xbf16>, vector<16x128xf32> -> vector<16x128xf32>
      %37 = arith.addf %33, %36 : vector<16x128xf32>
      %c0_31 = arith.constant 0 : index
      %c0_32 = arith.constant 0 : index
      %38 = vector.load %arg11[%c0_31, %c0_32] : memref<1x128xf32, #tpu.memory_space<vmem>>, vector<1x128xf32>
      %39 = vector.broadcast %38 : vector<1x128xf32> to vector<16x128xf32>
      %40 = arith.addf %37, %39 : vector<16x128xf32>
      %cst_33 = arith.constant 0.000000e+00 : f32
      %41 = vector.broadcast %cst_33 : f32 to vector<16x128xf32>
      %42 = arith.maximumf %40, %41 : vector<16x128xf32>
      %43 = arith.truncf %42 : vector<16x128xf32> to vector<16x128xbf16>
      %c0_34 = arith.constant 0 : index
      %c0_35 = arith.constant 0 : index
      %44 = vector.load %arg12[%c0_34, %c0_35] : memref<128x128xbf16, #tpu.memory_space<vmem>>, vector<128x128xbf16>
      %cst_36 = arith.constant dense<0.000000e+00> : vector<16x128xf32>
      %45 = tpu.matmul %43, %44, %cst_36 {dimension_numbers = #tpu.dot_dimension_numbers<[1], [0], [0], [1], [0, 0, 1, 1], [], []>} : vector<16x128xbf16>, vector<128x128xbf16>, vector<16x128xf32> -> vector<16x128xf32>
      %c0_37 = arith.constant 0 : index
      %c0_38 = arith.constant 0 : index
      %46 = vector.load %arg13[%c0_37, %c0_38] : memref<1x128xf32, #tpu.memory_space<vmem>>, vector<1x128xf32>
      %47 = vector.broadcast %46 : vector<1x128xf32> to vector<16x128xf32>
      %48 = arith.addf %45, %47 : vector<16x128xf32>
      %cst_39 = arith.constant 0.000000e+00 : f32
      %49 = vector.broadcast %cst_39 : f32 to vector<16x128xf32>
      %50 = arith.maximumf %48, %49 : vector<16x128xf32>
      %c0_40 = arith.constant 0 : index
      %c0_41 = arith.constant 0 : index
      %51 = vector.load %arg14[%c0_40, %c0_41] : memref<1x128xf32, #tpu.memory_space<vmem>>, vector<1x128xf32>
      %52 = vector.broadcast %51 : vector<1x128xf32> to vector<16x128xf32>
      %53 = arith.mulf %50, %52 : vector<16x128xf32>
      %cst_42 = arith.constant dense<0.000000e+00> : vector<16xf32>
      %54 = vector.multi_reduction <add>, %53, %cst_42 [1] : vector<16x128xf32> to vector<16xf32>
      %55 = vector.shape_cast %54 : vector<16xf32> to vector<16x1xf32>
      %c0_43 = arith.constant 0 : index
      %c0_44 = arith.constant 0 : index
      %56 = vector.load %arg15[%c0_43, %c0_44] : memref<1x1xf32, #tpu.memory_space<vmem>>, vector<1x1xf32>
      %57 = vector.broadcast %56 : vector<1x1xf32> to vector<16x1xf32>
      %58 = arith.addf %55, %57 : vector<16x1xf32>
      %c0_45 = arith.constant 0 : index
      %c0_46 = arith.constant 0 : index
      %59 = vector.load %arg16[%c0_45, %c0_46] : memref<16x1xf32, #tpu.memory_space<vmem>>, vector<16x1xf32>
      tpu.vector_store %arg16[%c0_45, %c0_46], %58 {strides = array<i32>} : memref<16x1xf32, #tpu.memory_space<vmem>>, vector<16x1xf32>,
    } else {
    }
    return
  }
  func.func @transform_0(%arg0: i32, %arg1: i32) -> (i32, i32) {
    %c0_i32 = arith.constant 0 : i32
    return %arg0, %arg1 : i32, i32
  }
  func.func @transform_1(%arg0: i32, %arg1: i32) -> (i32, i32) {
    %c0_i32 = arith.constant 0 : i32
    %c0_i32_0 = arith.constant 0 : i32
    return %arg0, %c0_i32 : i32, i32
  }
  func.func @transform_2(%arg0: i32, %arg1: i32) -> (i32, i32) {
    %c0_i32 = arith.constant 0 : i32
    %c0_i32_0 = arith.constant 0 : i32
    return %arg0, %c0_i32 : i32, i32
  }
  func.func @transform_3(%arg0: i32, %arg1: i32) -> (i32, i32) {
    %c0_i32 = arith.constant 0 : i32
    %c0_i32_0 = arith.constant 0 : i32
    return %arg1, %c0_i32 : i32, i32
  }
  func.func @transform_4(%arg0: i32, %arg1: i32) -> (i32, i32) {
    %c0_i32 = arith.constant 0 : i32
    %c0_i32_0 = arith.constant 0 : i32
    %c0_i32_1 = arith.constant 0 : i32
    return %c0_i32, %c0_i32_0 : i32, i32
  }
  func.func @transform_5(%arg0: i32, %arg1: i32) -> (i32, i32) {
    %c0_i32 = arith.constant 0 : i32
    %c0_i32_0 = arith.constant 0 : i32
    %c0_i32_1 = arith.constant 0 : i32
    return %c0_i32, %c0_i32_0 : i32, i32
  }
  func.func @transform_6(%arg0: i32, %arg1: i32) -> (i32, i32) {
    %c0_i32 = arith.constant 0 : i32
    %c0_i32_0 = arith.constant 0 : i32
    %c0_i32_1 = arith.constant 0 : i32
    return %c0_i32, %c0_i32_0 : i32, i32
  }
  func.func @transform_7(%arg0: i32, %arg1: i32) -> (i32, i32) {
    %c0_i32 = arith.constant 0 : i32
    %c0_i32_0 = arith.constant 0 : i32
    %c0_i32_1 = arith.constant 0 : i32
    return %c0_i32, %c0_i32_0 : i32, i32
  }
  func.func @transform_8(%arg0: i32, %arg1: i32) -> (i32, i32) {
    %c0_i32 = arith.constant 0 : i32
    %c0_i32_0 = arith.constant 0 : i32
    %c0_i32_1 = arith.constant 0 : i32
    return %c0_i32, %c0_i32_0 : i32, i32
  }
  func.func @transform_9(%arg0: i32, %arg1: i32) -> (i32, i32) {
    %c0_i32 = arith.constant 0 : i32
    %c0_i32_0 = arith.constant 0 : i32
    %c0_i32_1 = arith.constant 0 : i32
    return %c0_i32, %c0_i32_0 : i32, i32
  }
  func.func @transform_10(%arg0: i32, %arg1: i32) -> (i32, i32) {
    %c0_i32 = arith.constant 0 : i32
    %c0_i32_0 = arith.constant 0 : i32
    %c0_i32_1 = arith.constant 0 : i32
    return %c0_i32, %c0_i32_0 : i32, i32
  }
  func.func @transform_11(%arg0: i32, %arg1: i32) -> (i32, i32) {
    %c0_i32 = arith.constant 0 : i32
    %c0_i32_0 = arith.constant 0 : i32
    %c0_i32_1 = arith.constant 0 : i32
    return %c0_i32, %c0_i32_0 : i32, i32
  }
  func.func @transform_12(%arg0: i32, %arg1: i32) -> (i32, i32) {
    %c0_i32 = arith.constant 0 : i32
    %c0_i32_0 = arith.constant 0 : i32
    %c0_i32_1 = arith.constant 0 : i32
    return %c0_i32, %c0_i32_0 : i32, i32
  }
  func.func @transform_13(%arg0: i32, %arg1: i32) -> (i32, i32) {
    %c0_i32 = arith.constant 0 : i32
    %c0_i32_0 = arith.constant 0 : i32
    %c0_i32_1 = arith.constant 0 : i32
    return %c0_i32, %c0_i32_0 : i32, i32
  }
  func.func @transform_14(%arg0: i32, %arg1: i32) -> (i32, i32) {
    %c0_i32 = arith.constant 0 : i32
    %c0_i32_0 = arith.constant 0 : i32
    return %arg0, %c0_i32 : i32, i32
  }
}

</mosaic_0001>

<bundles_post_ra>
// kernel: tpu_custom_call.1
= control target key start
LH: loop header
LB: loop body
LE: loop exit
PB: predicated region body
PF: predicated region fallthrough
CT: control target
= control target key end

     0   :  { %s1476_s0 = inlined_call_operand.hbm [shape: bf16[16,128], index: 0, kind: input, shape index: {}]   ;;  %s1477_s1 = inlined_call_operand.hbm [shape: f32[16,256], index: 1, kind: input, shape index: {}]   ;;  %s1478_s2 = inlined_call_operand.hbm [shape: bf16[16,64], index: 2, kind: input, shape index: {}]   ;;  %s1479_s3 = inlined_call_operand.hbm [shape: bf16[128,128], index: 3, kind: input, shape index: {}]   ;;  %s1480_s4 = inlined_call_operand.vmem [shape: f32[1,128], index: 4, kind: input, shape index: {}]   ;;  %s1481_s5 = inlined_call_operand.hbm [shape: bf16[64,256], index: 5, kind: input, shape index: {}]   ;;  %s1482_s6 = inlined_call_operand.vmem [shape: f32[1,256], index: 6, kind: input, shape index: {}]   ;;  %s1483_s7 = inlined_call_operand.hbm [shape: bf16[128,128], index: 7, kind: input, shape index: {}]   ;;  %s1484_s8 = inlined_call_operand.hbm [shape: bf16[256,128], index: 8, kind: input, shape index: {}]   ;;  %s1485_s9 = inlined_call_operand.vmem [shape: f32[1,128], index: 9, kind: input, shape index: {}]   ;;  %s1486_s10 = inlined_call_operand.hbm [shape: bf16[128,128], index: 10, kind: input, shape index: {}]   ;;  %s1487_s11 = inlined_call_operand.vmem [shape: f32[1,128], index: 11, kind: input, shape index: {}]   ;;  %s1488_s12 = inlined_call_operand.vmem [shape: f32[1,128], index: 12, kind: input, shape index: {}]   ;;  %s1489_s13 = inlined_call_operand.<no memory space> [shape: f32[1,1], index: 13, kind: input, shape index: {}]   ;;  %s1490_s14 = inlined_call_operand.vmem [shape: f32[16,1], index: 14, kind: output, shape index: {}]  }
   0x1   :  { %v19_v0 = vstv %s1489_s13 }
   0x2   :  { %20 = vst [vmem:[#allocation3] sm:$0x1] %v19_v0 }
   0x3   :  { %21 = vsyncpa [#allocation5], 0 }
   0x4   :  { %22 = vsyncpa [#allocation7], 0 }
   0x5   :  { %23 = vsyncpa [#allocation10], 0 }
   0x6   :  { %24 = vsyncpa [#allocation13], 0  ;;  %s43_s17 = sshll.u32 %s1477_s1, 4  ;;  %s44_s17 = int_to_ptr.hbm [resolvable:$true] %s43_s17 }
   0x7   :  { %25 = vsyncpa [#allocation16], 0  ;;  %s1314_s18 = smov [#allocation6]   ;;  %s1315_s20 = smov 256  }
   0x8   :  { %s45_s19 = sshll.u32 %s1314_s18, 4  ;;  %s1316_s21 = smov 16   ;;  %s46_s19 = int_to_ptr.vmem [resolvable:$true] %s45_s19 }
   0x9   :  { %51 = dma.hbm_to_vmem [thread:$0]  %s44_s17, 512, %s46_s19, [#allocation7], %s1315_s20, %s1315_s20, %s1316_s21  }
   0xa   :  { %s69_s13 = sshll.u32 %s1479_s3, 4  ;;  %s1317_s24 = smov [#allocation9]   ;;  %s70_s13 = int_to_ptr.hbm [resolvable:$true] %s69_s13 }
   0xb   :  { %s71_s25 = sshll.u32 %s1317_s24, 4  ;;  %s99_s28 = sshll.u32 %s1483_s7, 4  ;;  %s72_s25 = int_to_ptr.vmem [resolvable:$true] %s71_s25  ;;  %s100_s28 = int_to_ptr.hbm [resolvable:$true] %s99_s28 }
   0xc   :  { %s1318_s1 = smov 64   ;;  %s1319_s29 = smov 4  }
   0xd   :  { %77 = dma.hbm_to_vmem [thread:$0]  %s70_s13, 1024, %s72_s25, [#allocation10], %s1318_s1, %s1318_s1, %s1319_s29  }
   0xe   :  { %s30_s16 = sshll.u32 %s1476_s0, 4  ;;  %s1320_s3 = smov [#allocation12]   ;;  %s31_s16 = int_to_ptr.hbm [resolvable:$true] %s30_s16 }
   0xf   :  { %s101_s17 = sshll.u32 %s1320_s3, 4  ;;  %s1321_s7 = smov [#allocation4]   ;;  %s102_s17 = int_to_ptr.vmem [resolvable:$true] %s101_s17 }
  0x10   :  { %107 = dma.hbm_to_vmem [thread:$0]  %s100_s28, 1024, %s102_s17, [#allocation13], %s1318_s1, %s1318_s1, %s1319_s29  }
  0x11   :  { %s32_s18 = sshll.u32 %s1321_s7, 4  ;;  %s56_s21 = sshll.u32 %s1478_s2, 4  ;;  %s33_s18 = int_to_ptr.vmem [resolvable:$true] %s32_s18  ;;  %s57_s21 = int_to_ptr.hbm [resolvable:$true] %s56_s21 }
  0x12   :  { %38 = dma.hbm_to_vmem [thread:$0]  %s31_s16, 128, %s33_s18, [#allocation5], %s1318_s1, %s1318_s1, %s1319_s29  }
  0x13   :  { %s84_s23 = sshll.u32 %s1481_s5, 4  ;;  %s1322_s13 = smov [#allocation8]   ;;  %s85_s23 = int_to_ptr.hbm [resolvable:$true] %s84_s23 }
  0x14   :  { %s58_s24 = sshll.u32 %s1322_s13, 4  ;;  %s1323_s25 = smov [#allocation11]   ;;  %s59_s24 = int_to_ptr.vmem [resolvable:$true] %s58_s24 }
  0x15   :  { %64 = dma.hbm_to_vmem [thread:$0]  %s57_s21, 128, %s59_s24, [#allocation7], %s1318_s1, %s1318_s1, %s1319_s29  }
  0x16   :  { %s86_s2 = sshll.u32 %s1323_s25, 4  ;;  %s1324_s26 = smov 128   ;;  %s87_s2 = int_to_ptr.vmem [resolvable:$true] %s86_s2 }
  0x17   :  { %s1325_s27 = smov 8   ;;  %s112_s15 = sshll.u32 %s1484_s8, 4  ;;  %s113_s15 = int_to_ptr.hbm [resolvable:$true] %s112_s15 }
  0x18   :  { %92 = dma.hbm_to_vmem [thread:$0]  %s85_s23, 1024, %s87_s2, [#allocation10], %s1324_s26, %s1324_s26, %s1325_s27  }
  0x19   :  { %s1326_s5 = smov [#allocation14]   ;;  %s127_s7 = sshll.u32 %s1486_s10, 4  ;;  %s128_s7 = int_to_ptr.hbm [resolvable:$true] %s127_s7 }
  0x1a   :  { %s114_s16 = sshll.u32 %s1326_s5, 4  ;;  %s1327_s18 = smov [#allocation15]   ;;  %s115_s16 = int_to_ptr.vmem [resolvable:$true] %s114_s16 }
  0x1b   :  { %120 = dma.hbm_to_vmem [thread:$0]  %s113_s15, 2048, %s115_s16, [#allocation13], %s1318_s1, %s1318_s1, %s1319_s29  }
  0x1c   :  { %s129_s19 = sshll.u32 %s1327_s18, 4  ;;  %s130_s19 = int_to_ptr.vmem [resolvable:$true] %s129_s19 }
  0x1d   :  { %135 = dma.hbm_to_vmem [thread:$0]  %s128_s7, 1024, %s130_s19, [#allocation16], %s1318_s1, %s1318_s1, %s1319_s29  }
  0x1e   :  { %1304 = dma.done.wait [#allocation5], 128  }
  0x1f   :  { %1305 = vsyncadd [#allocation5], 4294967168 }
  0x20   :  { %1306 = dma.done.wait [#allocation7], 640  }
  0x21   :  { %1307 = vsyncadd [#allocation7], 4294966656 }
  0x22   :  { %1308 = dma.done.wait [#allocation10], 2048  }
  0x23   :  { %1309 = vsyncadd [#allocation10], 4294965248 }
  0x24   :  { %1310 = dma.done.wait [#allocation13], 3072  }
  0x25   :  { %1311 = vsyncadd [#allocation13], 4294964224 }
  0x26   :  { %1312 = dma.done.wait [#allocation16], 1024  }
  0x27   :  { %1313 = vsyncadd [#allocation16], 4294966272  ;;  %v1035_v1 = vld [vmem:[#allocation9 + $0x38] sm:$0xff]  ;;  %v887_v2 = vld [vmem:[#allocation11 + $0x30] sm:$0xf]  ;;  %vm347_vm0 = vcmask 523264  }
  0x28   :  { %v1044_v3 = vld [vmem:[#allocation11 + $0x34] sm:$0xf0]  ;;  %v1043_v5 = vld [vmem:[#allocation11 + $0x34] sm:$0xf]  ;;  %v889_v6 = vld [vmem:[#allocation11 + $0x38] sm:$0xf0]  ;;  %255 = vmatpush.bf16.msra.mxu0 %v1035_v1 }
  0x29   :  { %v888_v4 = vor.u32 %v1044_v3, %v887_v2  ;;  %v1034_v7 = vld [vmem:[#allocation9 + $0x30] sm:$0xff]  ;;  %v892_v8 = vor.u32 %v1043_v5, %v889_v6  ;;  %v879_v9 = vld [vmem:[#allocation11 + $0x20] sm:$0xf]  ;;  %v1042_v10 = vld [vmem:[#allocation11 + $0x24] sm:$0xf0] }
  0x2a   :  { %v1041_v11 = vld [vmem:[#allocation11 + $0x24] sm:$0xf]  ;;  %v880_v12 = vor.u32 %v1042_v10, %v879_v9  ;;  %v881_v13 = vld [vmem:[#allocation11 + $0x28] sm:$0xf0]  ;;  %v871_v15 = vld [vmem:[#allocation11 + $0x10] sm:$0xf] }
  0x2b   :  { %355 = vmatpush.bf16.msra.mxu1 %v888_v4  ;;  %369 = vmatpush.bf16.msra.mxu2 %v892_v8  ;;  %v884_v14 = vor.u32 %v1041_v11, %v881_v13  ;;  %v1040_v16 = vld [vmem:[#allocation11 + $0x14] sm:$0xf0]  ;;  %v1039_v17 = vld [vmem:[#allocation11 + $0x14] sm:$0xf]  ;;  %v873_v18 = vld [vmem:[#allocation11 + $0x18] sm:$0xf0] }
  0x2c   :  { %256 = vmatpush.bf16.msra.mxu0 %v1034_v7  ;;  %v1033_v19 = vld [vmem:[#allocation9 + $0x28] sm:$0xff]  ;;  %v872_v20 = vor.u32 %v1040_v16, %v871_v15  ;;  %v876_v21 = vor.u32 %v1039_v17, %v873_v18  ;;  %v1032_v22 = vld [vmem:[#allocation9 + $0x20] sm:$0xff]  ;;  %v1036_v29 = vld [vmem:[#allocation8] sm:$0xff] }
  0x2d   :  { %v863_v23 = vld [vmem:[#allocation11] sm:$0xf]  ;;  %v1038_v24 = vld [vmem:[#allocation11 + $0x4] sm:$0xf0]  ;;  %v1037_v25 = vld [vmem:[#allocation11 + $0x4] sm:$0xf] }
  0x2e   :  { %v865_v26 = vld [vmem:[#allocation11 + $0x8] sm:$0xf0]  ;;  %v864_v27 = vor.u32 %v1038_v24, %v863_v23  ;;  %v1031_v30 = vld [vmem:[#allocation9 + $0x18] sm:$0xff]  ;;  %v1030_v31 = vld [vmem:[#allocation9 + $0x10] sm:$0xff] }
  0x2f   :  { %356 = vmatpush.bf16.msra.mxu1 %v880_v12  ;;  %370 = vmatpush.bf16.msra.mxu2 %v884_v14  ;;  %v868_v28 = vor.u32 %v1037_v25, %v865_v26  ;;  %v1029_v32 = vld [vmem:[#allocation9 + $0x8] sm:$0xff]  ;;  %v1028_v33 = vld [vmem:[#allocation9] sm:$0xff]  ;;  %v1027_v34 = vld [vmem:[#allocation4] sm:$0xff] }
  0x30   :  { %257 = vmatpush.bf16.msra.mxu0 %v1033_v19  ;;  %v1052_v35 = vld [vmem:[#allocation12 + $0x38] sm:$0xff]  ;;  %v1051_v36 = vld [vmem:[#allocation12 + $0x30] sm:$0xff]  ;;  %v1050_v37 = vld [vmem:[#allocation12 + $0x28] sm:$0xff] }
  0x31   :  { %v1049_v38 = vld [vmem:[#allocation12 + $0x20] sm:$0xff]  ;;  %v1060_v39 = vld [vmem:[#allocation14 + $0x38] sm:$0xff]  ;;  %v1059_v41 = vld [vmem:[#allocation14 + $0x30] sm:$0xff] }
  0x32   :  { %610 = vmatpush.bf16.msra.mxu3 %v1060_v39  ;;  %v1048_v40 = vld [vmem:[#allocation12 + $0x18] sm:$0xff]  ;;  %v1047_v43 = vld [vmem:[#allocation12 + $0x10] sm:$0xff]  ;;  %v1058_v44 = vld [vmem:[#allocation14 + $0x28] sm:$0xff] }
  0x33   :  { %357 = vmatpush.bf16.msra.mxu1 %v872_v20  ;;  %371 = vmatpush.bf16.msra.mxu2 %v876_v21  ;;  %v1068_v42 = vld [vmem:[#allocation14 + $0x78] sm:$0xff]  ;;  %v1067_v45 = vld [vmem:[#allocation14 + $0x70] sm:$0xff]  ;;  %v1046_v46 = vld [vmem:[#allocation12 + $0x8] sm:$0xff] }
  0x34   :  { %258 = vmatpush.bf16.msra.mxu0 %v1032_v22  ;;  %v1057_v47 = vld [vmem:[#allocation14 + $0x20] sm:$0xff]  ;;  %v1066_v48 = vld [vmem:[#allocation14 + $0x68] sm:$0xff]  ;;  %v1056_v51 = vld [vmem:[#allocation14 + $0x18] sm:$0xff] }
  0x35   :  { %v296_v49 = vld [vmem:[%s1482_s6] sm:$0x3]  ;;  %v1045_v50 = vld [vmem:[#allocation12] sm:$0xff]  ;;  %v1064_v57 = vld [vmem:[#allocation14 + $0x58] sm:$0xff] }
  0x36   :  { %611 = vmatpush.bf16.msra.mxu3 %v1059_v41  ;;  %v298_v52 = vperm.slane %v296_v49, 0  ;;  %v1065_v53 = vld [vmem:[#allocation14 + $0x60] sm:$0xff]  ;;  %v1055_v54 = vld [vmem:[#allocation14 + $0x10] sm:$0xff]  ;;  %v1054_v59 = vld [vmem:[#allocation14 + $0x8] sm:$0xff]  ;;  %v299_v60 = vperm.slane %v296_v49, 1 }
  0x37   :  { %358 = vmatpush.bf16.msra.mxu1 %v864_v27  ;;  %372 = vmatpush.bf16.msra.mxu2 %v868_v28  ;;  %v1063_v61 = vld [vmem:[#allocation14 + $0x50] sm:$0xff]  ;;  %v1053_v62 = vld [vmem:[#allocation14] sm:$0xff]  ;;  %v1062_v0 = vld [vmem:[#allocation14 + $0x48] sm:$0xff] }
  0x38   :  { %259 = vmatpush.bf16.msra.mxu0 %v1031_v30  ;;  %v1061_v7 = vld [vmem:[#allocation14 + $0x40] sm:$0xff]  ;;  %v1091_v12 = vld [vmem:[%s1480_s4] ss:$0 sm:$0xff] }
  0x3a   :  { %893 = vmatmul.msk.bf16.vlgmr.msra.gmra.mxu1 %vm347_vm0, %v1036_v29  ;;  %894 = vmatmul.msk.bf16.vlgmr.msra.gmra.mxu2 %vm347_vm0, %v1036_v29 }
  0x3b   :  { %686 = vmatpush.bf16.msrb.mxu2 %v1052_v35  ;;  %624 = vmatpush.bf16.msrb.mxu1 %v1068_v42 }
  0x3c   :  { %260 = vmatpush.bf16.msra.mxu0 %v1030_v31  ;;  %612 = vmatpush.bf16.msra.mxu3 %v1058_v44 }
  0x3f   :  { %687 = vmatpush.bf16.msrb.mxu2 %v1051_v36  ;;  %625 = vmatpush.bf16.msrb.mxu1 %v1067_v45 }
  0x40   :  { %261 = vmatpush.bf16.msra.mxu0 %v1029_v32  ;;  %613 = vmatpush.bf16.msra.mxu3 %v1057_v47 }
  0x43   :  { %688 = vmatpush.bf16.msrb.mxu2 %v1050_v37  ;;  %626 = vmatpush.bf16.msrb.mxu1 %v1066_v48 }
  0x44   :  { %262 = vmatpush.bf16.msra.mxu0 %v1028_v33  ;;  %614 = vmatpush.bf16.msra.mxu3 %v1056_v51  ;;  %v457_v51 = vld [vmem:[#allocation6 + $0x10] sm:$0xff] }
  0x47   :  { %263 = vmatmul.bf16.vlgmr.msra.gmra.mxu0 %v1027_v34  ;;  %689 = vmatpush.bf16.msrb.mxu2 %v1049_v38 }
  0x48   :  { %627 = vmatpush.bf16.msrb.mxu1 %v1065_v53  ;;  %615 = vmatpush.bf16.msra.mxu3 %v1055_v54 }
  0x4b   :  { %690 = vmatpush.bf16.msrb.mxu2 %v1048_v40 }
  0x4c   :  { %628 = vmatpush.bf16.msrb.mxu1 %v1064_v57  ;;  %616 = vmatpush.bf16.msra.mxu3 %v1054_v59 }
  0x4f   :  { %691 = vmatpush.bf16.msrb.mxu2 %v1047_v43 }
  0x50   :  { %629 = vmatpush.bf16.msrb.mxu1 %v1063_v61  ;;  %617 = vmatpush.bf16.msra.mxu3 %v1053_v62 }
  0x53   :  { %692 = vmatpush.bf16.msrb.mxu2 %v1046_v46 }
  0x54   :  { %630 = vmatpush.bf16.msrb.mxu1 %v1062_v0 }
  0x57   :  { %693 = vmatpush.bf16.msrb.mxu2 %v1045_v50  ;;  %v455_v50 = vld [vmem:[#allocation6] sm:$0xff] }
  0x58   :  { %631 = vmatpush.bf16.msrb.mxu1 %v1061_v7 }
  0xb7   :  { %v360_v55 = vpop.f32.mrf.mxu1 }
  0xb8   :  { %v361_v56 = vadd.f32 %v360_v55, %v298_v52 }
  0xba   :  { %v895_v58 = vmul.f32 -1.442695, %v361_v56 }
  0xbc   :  { %1096 = vpow2.f32 %v895_v58 }
  0xbd   :  { %v374_v63 = vpop.f32.mrf.mxu2 }
  0xbe   :  { %v375_v1 = vadd.f32 %v374_v63, %v299_v60 }
  0xbf   :  { %v362_v2 = vpop.f32.mrf.mxu1 }
  0xc0   :  { %v363_v3 = vadd.f32 %v362_v2, %v298_v52  ;;  %v896_v4 = vmul.f32 -1.442695, %v375_v1 }
  0xc2   :  { %v1097_v5 = vpop.eup %1096  ;;  %v897_v6 = vmul.f32 -1.442695, %v363_v3  ;;  %1098 = vpow2.f32 %v896_v4 }
  0xc3   :  { %v391_v8 = vadd.f32 1.0, %v1097_v5  ;;  %v456_v5 = vld [vmem:[#allocation6 + $0x8] sm:$0xff] }
  0xc4   :  { %1100 = vpow2.f32 %v897_v6  ;;  %v264_v10 = vpop.f32.mrf.mxu0  ;;  %v458_v6 = vld [vmem:[#allocation6 + $0x18] sm:$0xff] }
  0xc5   :  { %1102 = vrcp.f32 %v391_v8  ;;  %v376_v9 = vpop.f32.mrf.mxu2  ;;  %v282_v19 = vadd.f32 %v1091_v12, %v264_v10  ;;  %v406_v36 = vand.u32 2147483648, %v391_v8  ;;  %vm400_vm2 = vweird.f32 %v391_v8 }
  0xc6   :  { %v377_v11 = vadd.f32 %v376_v9, %v299_v60  ;;  %v404_v37 = vand.u32 2147483647, %v391_v8 }
  0xc7   :  { %v284_v23 = vmax.f32 %v282_v19, 0.0  ;;  %v407_v44 = vor.u32 1.1754944e-38, %v406_v36  ;;  %v1069_v19 = vld [vmem:[#allocation15] sm:$0xff]  ;;  %v1093_v36 = vld [vmem:[%s1487_s11] ss:$0 sm:$0xff] }
  0xc8   :  { %v1099_v13 = vpop.eup %1098  ;;  %v898_v14 = vmul.f32 -1.442695, %v377_v11  ;;  %vm405_vm5 = vcmp.eq.f32.partialorder %v404_v37, 8.507059e+37 }
  0xc9   :  { %v1454_v16 = vadd.f32 1.0, %v1099_v13  ;;  %v1075_v13 = vld [vmem:[#allocation15 + $0x30] sm:$0xff] }
  0xca   :  { %v1101_v15 = vpop.eup %1100  ;;  %1104 = vpow2.f32 %v898_v14  ;;  %v1074_v14 = vld [vmem:[#allocation15 + $0x28] sm:$0xff] }
  0xcb   :  { %v1103_v17 = vpop.eup %1102  ;;  %v393_v18 = vadd.f32 1.0, %v1101_v15  ;;  %1106 = vrcp.f32 %v1454_v16  ;;  %v421_v54 = vand.u32 2147483648, %v1454_v16  ;;  %vm415_vm10 = vweird.f32 %v1454_v16  ;;  %v1073_v15 = vld [vmem:[#allocation15 + $0x20] sm:$0xff] }
  0xcc   :  { %v396_v20 = vmul.f32 %v1103_v17, %v391_v8  ;;  %v266_v21 = vpop.f32.mrf.mxu0  ;;  %vm401_vm1 = vweird.f32 %v1103_v17  ;;  %v419_v57 = vand.u32 2147483647, %v1454_v16 }
  0xcd   :  { %1108 = vrcp.f32 %v393_v18  ;;  %v283_v24 = vadd.f32 %v1091_v12, %v266_v21  ;;  %v436_v39 = vand.u32 2147483648, %v393_v18  ;;  %vm402_vm3 = vmor %vm400_vm2, %vm401_vm1  ;;  %v434_v43 = vand.u32 2147483647, %v393_v18  ;;  %v1076_v12 = vld [vmem:[#allocation15 + $0x38] sm:$0xff] }
  0xce   :  { %v397_v22 = vsub.f32 1.0, %v396_v20  ;;  %vm430_vm6 = vweird.f32 %v393_v18  ;;  %v422_v1 = vor.u32 1.1754944e-38, %v421_v54  ;;  %vm420_vm13 = vcmp.eq.f32.partialorder %v419_v57, 8.507059e+37  ;;  %777 = vmatpush.bf16.msrb.mxu0 %v1076_v12 }
  0xcf   :  { %v285_v27 = vmax.f32 %v283_v24, 0.0  ;;  %v437_v47 = vor.u32 1.1754944e-38, %v436_v39  ;;  %vm435_vm9 = vcmp.eq.f32.partialorder %v434_v43, 8.507059e+37  ;;  %v1094_v39 = vld [vmem:[%s1488_s12] ss:$0 sm:$0xff]  ;;  %vm809_vm1 = vcmask 7168  }
  0xd0   :  { %v398_v25 = vmul.f32 %v1103_v17, %v397_v22  ;;  %v1105_v26 = vpop.eup %1104 }
  0xd1   :  { %v1107_v28 = vpop.eup %1106  ;;  %v394_v29 = vadd.f32 1.0, %v1105_v26  ;;  %v463_v32 = vpack.c.bf16 %v285_v27, %v284_v23 }
  0xd2   :  { %v411_v31 = vmul.f32 %v1107_v28, %v1454_v16  ;;  %v399_v33 = vadd.f32 %v1103_v17, %v398_v25  ;;  %vm416_vm8 = vweird.f32 %v1107_v28  ;;  %778 = vmatpush.bf16.msrb.mxu0 %v1075_v13  ;;  %v1072_v16 = vld [vmem:[#allocation15 + $0x18] sm:$0xff]  ;;  %v1092_v25 = vld [vmem:[%s1485_s9] ss:$0 sm:$0xff] }
  0xd3   :  { %v1109_v30 = vpop.eup %1108  ;;  %1110 = vrcp.f32 %v394_v29  ;;  %694 = vmatmul.bf16.vlgmr.msrb.gmra.mxu2 %v463_v32  ;;  %vm417_vm11 = vmor %vm415_vm10, %vm416_vm8  ;;  %v451_v60 = vand.u32 2147483648, %v394_v29  ;;  %v449_v63 = vand.u32 2147483647, %v394_v29  ;;  %vm445_vm14 = vweird.f32 %v394_v29 }
  0xd4   :  { %v426_v34 = vmul.f32 %v1109_v30, %v393_v18  ;;  %v412_v35 = vsub.f32 1.0, %v411_v31  ;;  %v403_v41 = vsel %vm402_vm3, %v1103_v17, %v399_v33  ;;  %vm431_vm4 = vweird.f32 %v1109_v30  ;;  %v1071_v17 = vld [vmem:[#allocation15 + $0x10] sm:$0xff]  ;;  %v1070_v18 = vld [vmem:[#allocation15 + $0x8] sm:$0xff] }
  0xd5   :  { %v408_v49 = vsel %vm405_vm5, %v407_v44, %v403_v41  ;;  %vm432_vm7 = vmor %vm430_vm6, %vm431_vm4  ;;  %v452_v4 = vor.u32 1.1754944e-38, %v451_v60  ;;  %vm450_vm0 = vcmp.eq.f32.partialorder %v449_v63, 8.507059e+37 }
  0xd6   :  { %v427_v38 = vsub.f32 1.0, %v426_v34  ;;  %v413_v40 = vmul.f32 %v1107_v28, %v412_v35  ;;  %v459_v58 = vmul.f32 %v455_v50, %v408_v49  ;;  %779 = vmatpush.bf16.msrb.mxu0 %v1074_v14 }
  0xd8   :  { %v428_v42 = vmul.f32 %v1109_v30, %v427_v38  ;;  %v414_v52 = vadd.f32 %v1107_v28, %v413_v40 }
  0xd9   :  { %v1111_v45 = vpop.eup %1110 }
  0xda   :  { %v429_v46 = vadd.f32 %v1109_v30, %v428_v42  ;;  %v441_v48 = vmul.f32 %v1111_v45, %v394_v29  ;;  %v418_v61 = vsel %vm417_vm11, %v1107_v28, %v414_v52  ;;  %vm446_vm12 = vweird.f32 %v1111_v45  ;;  %780 = vmatpush.bf16.msrb.mxu0 %v1073_v15 }
  0xdb   :  { %v423_v3 = vsel %vm420_vm13, %v422_v1, %v418_v61  ;;  %vm447_vm15 = vmor %vm445_vm14, %vm446_vm12 }
  0xdc   :  { %v433_v53 = vsel %vm432_vm7, %v1109_v30, %v429_v46  ;;  %v442_v55 = vsub.f32 1.0, %v441_v48  ;;  %v460_v9 = vmul.f32 %v456_v5, %v423_v3  ;;  %v1095_v46 = vld [vmem:[#allocation3] ss:$0 sm:$0xff] }
  0xdd   :  { %v438_v56 = vsel %vm435_vm9, %v437_v47, %v433_v53 }
  0xde   :  { %v461_v59 = vmul.f32 %v457_v51, %v438_v56  ;;  %v443_v62 = vmul.f32 %v1111_v45, %v442_v55  ;;  %781 = vmatpush.bf16.msrb.mxu0 %v1072_v16 }
  0xe0   :  { %v480_v0 = vpack.c.bf16 %v461_v59, %v459_v58  ;;  %v444_v2 = vadd.f32 %v1111_v45, %v443_v62 }
  0xe2   :  { %618 = vmatmul.bf16.vlgmr.msra.gmra.mxu3 %v480_v0  ;;  %v448_v7 = vsel %vm447_vm15, %v1111_v45, %v444_v2  ;;  %782 = vmatpush.bf16.msrb.mxu0 %v1071_v17 }
  0xe3   :  { %v453_v8 = vsel %vm450_vm0, %v452_v4, %v448_v7 }
  0xe4   :  { %v462_v10 = vmul.f32 %v458_v6, %v453_v8 }
  0xe6   :  { %v481_v11 = vpack.c.bf16 %v462_v10, %v460_v9  ;;  %783 = vmatpush.bf16.msrb.mxu0 %v1070_v18 }
  0xe8   :  { %632 = vmatmul.bf16.vlgmr.msrb.gmra.mxu1 %v481_v11 }
  0xea   :  { %784 = vmatpush.bf16.msrb.mxu0 %v1069_v19 }
 0x156   :  { %v695_v21 = vpop.f32.mrf.mxu2 }
 0x15e   :  { %v697_v29 = vpop.f32.mrf.mxu2 }
 0x165   :  { %v619_v20 = vpop.f32.mrf.mxu3  ;;  %v633_v22 = vpop.f32.mrf.mxu1 }
 0x166   :  { %v634_v23 = vadd.f32 %v633_v22, %v619_v20 }
 0x168   :  { %v696_v24 = vadd.f32 %v695_v21, %v634_v23 }
 0x16a   :  { %v704_v30 = vadd.f32 %v1092_v25, %v696_v24 }
 0x16c   :  { %v706_v33 = vmax.f32 %v704_v30, 0.0 }
 0x16d   :  { %v621_v26 = vpop.f32.mrf.mxu3  ;;  %v635_v27 = vpop.f32.mrf.mxu1 }
 0x16e   :  { %v636_v28 = vadd.f32 %v635_v27, %v621_v26 }
 0x170   :  { %v698_v31 = vadd.f32 %v697_v29, %v636_v28 }
 0x172   :  { %v705_v32 = vadd.f32 %v1092_v25, %v698_v31 }
 0x174   :  { %v707_v34 = vmax.f32 %v705_v32, 0.0 }
 0x176   :  { %v708_v35 = vpack.c.bf16 %v707_v34, %v706_v33 }
 0x178   :  { %785 = vmatmul.bf16.vlgmr.msrb.gmra.mxu0 %v708_v35 }
 0x1f5   :  { %v786_v37 = vpop.f32.mrf.mxu0 }
 0x1f6   :  { %v787_v38 = vadd.f32 %v1093_v36, %v786_v37 }
 0x1f8   :  { %v791_v40 = vmax.f32 %v787_v38, 0.0 }
 0x1fa   :  { %v797_v41 = vmul.f32 %v1094_v39, %v791_v40 }
 0x1fc   :  { %799 = vadd.xlane.f32.xlu0 %v797_v41 }
 0x1fd   :  { %v788_v42 = vpop.f32.mrf.mxu0 }
 0x1fe   :  { %v789_v43 = vadd.f32 %v1093_v36, %v788_v42 }
 0x200   :  { %v792_v44 = vmax.f32 %v789_v43, 0.0 }
 0x202   :  { %v798_v45 = vmul.f32 %v1094_v39, %v792_v44 }
 0x204   :  { %801 = vadd.xlane.f32.xlu0 %v798_v45 }
 0x26f   :  { %v800_v47 = vpop.xlane.xlu0 %799 }
 0x270   :  { %v807_v48 = vadd.f32 %v1095_v46, %v800_v47 }
 0x272   :  { %810 = vst.msk [vmem:[%s1490_s14] sm:$0xff] %vm809_vm1, %v807_v48 }
 0x277   :  { %v802_v49 = vpop.xlane.xlu0 %801 }
 0x278   :  { %v808_v50 = vadd.f32 %v1095_v46, %v802_v49 }
 0x27a   :  { %811 = vst.msk [vmem:[%s1490_s14 + $0x8] sm:$0xff] %vm809_vm1, %v808_v50 }
 0x27b   :  { %816 = vsyncpa [#allocation5], 1 }
 0x27c   :  { %817 = vsyncpa [#allocation7], 1 }
 0x27d   :  { %818 = vsyncpa [#allocation10], 1 }
 0x27e   :  { %819 = vsyncpa [#allocation13], 1 }
 0x27f   :  { %820 = vsyncpa [#allocation16], 1 }

// kernel: tpu_custom_call.1
= control target key start
LH: loop header
LB: loop body
LE: loop exit
PB: predicated region body
PF: predicated region fallthrough
CT: control target
= control target key end

     0   :  { %s1476_s0 = inlined_call_operand.hbm [shape: bf16[16,128], index: 0, kind: input, shape index: {}]   ;;  %s1477_s1 = inlined_call_operand.hbm [shape: f32[16,256], index: 1, kind: input, shape index: {}]   ;;  %s1478_s2 = inlined_call_operand.hbm [shape: bf16[16,64], index: 2, kind: input, shape index: {}]   ;;  %s1479_s3 = inlined_call_operand.hbm [shape: bf16[128,128], index: 3, kind: input, shape index: {}]   ;;  %s1480_s4 = inlined_call_operand.vmem [shape: f32[1,128], index: 4, kind: input, shape index: {}]   ;;  %s1481_s5 = inlined_call_operand.hbm [shape: bf16[64,256], index: 5, kind: input, shape index: {}]   ;;  %s1482_s6 = inlined_call_operand.vmem [shape: f32[1,256], index: 6, kind: input, shape index: {}]   ;;  %s1483_s7 = inlined_call_operand.hbm [shape: bf16[128,128], index: 7, kind: input, shape index: {}]   ;;  %s1484_s8 = inlined_call_operand.hbm [shape: bf16[256,128], index: 8, kind: input, shape index: {}]   ;;  %s1485_s9 = inlined_call_operand.vmem [shape: f32[1,128], index: 9, kind: input, shape index: {}]   ;;  %s1486_s10 = inlined_call_operand.hbm [shape: bf16[128,128], index: 10, kind: input, shape index: {}]   ;;  %s1487_s11 = inlined_call_operand.vmem [shape: f32[1,128], index: 11, kind: input, shape index: {}]   ;;  %s1488_s12 = inlined_call_operand.vmem [shape: f32[1,128], index: 12, kind: input, shape index: {}]   ;;  %s1489_s13 = inlined_call_operand.<no memory space> [shape: f32[1,1], index: 13, kind: input, shape index: {}]   ;;  %s1490_s14 = inlined_call_operand.vmem [shape: f32[16,1], index: 14, kind: output, shape index: {}]  }
   0x1   :  { %v19_v0 = vstv %s1489_s13 }
   0x2   :  { %20 = vst [vmem:[#allocation3] sm:$0x1] %v19_v0 }
   0x3   :  { %21 = vsyncpa [#allocation5], 0 }
   0x4   :  { %22 = vsyncpa [#allocation7], 0 }
   0x5   :  { %23 = vsyncpa [#allocation10], 0 }
   0x6   :  { %24 = vsyncpa [#allocation13], 0  ;;  %s43_s17 = sshll.u32 %s1477_s1, 4  ;;  %s44_s17 = int_to_ptr.hbm [resolvable:$true] %s43_s17 }
   0x7   :  { %25 = vsyncpa [#allocation16], 0  ;;  %s1314_s18 = smov [#allocation6]   ;;  %s1315_s20 = smov 256  }
   0x8   :  { %s45_s19 = sshll.u32 %s1314_s18, 4  ;;  %s1316_s21 = smov 16   ;;  %s46_s19 = int_to_ptr.vmem [resolvable:$true] %s45_s19 }
   0x9   :  { %51 = dma.hbm_to_vmem [thread:$0]  %s44_s17, 512, %s46_s19, [#allocation7], %s1315_s20, %s1315_s20, %s1316_s21  }
   0xa   :  { %s69_s13 = sshll.u32 %s1479_s3, 4  ;;  %s1317_s24 = smov [#allocation9]   ;;  %s70_s13 = int_to_ptr.hbm [resolvable:$true] %s69_s13 }
   0xb   :  { %s71_s25 = sshll.u32 %s1317_s24, 4  ;;  %s99_s28 = sshll.u32 %s1483_s7, 4  ;;  %s72_s25 = int_to_ptr.vmem [resolvable:$true] %s71_s25  ;;  %s100_s28 = int_to_ptr.hbm [resolvable:$true] %s99_s28 }
   0xc   :  { %s1318_s1 = smov 64   ;;  %s1319_s29 = smov 4  }
   0xd   :  { %77 = dma.hbm_to_vmem [thread:$0]  %s70_s13, 1024, %s72_s25, [#allocation10], %s1318_s1, %s1318_s1, %s1319_s29  }
   0xe   :  { %s30_s16 = sshll.u32 %s1476_s0, 4  ;;  %s1320_s3 = smov [#allocation12]   ;;  %s31_s16 = int_to_ptr.hbm [resolvable:$true] %s30_s16 }
   0xf   :  { %s101_s17 = sshll.u32 %s1320_s3, 4  ;;  %s1321_s7 = smov [#allocation4]   ;;  %s102_s17 = int_to_ptr.vmem [resolvable:$true] %s101_s17 }
  0x10   :  { %107 = dma.hbm_to_vmem [thread:$0]  %s100_s28, 1024, %s102_s17, [#allocation13], %s1318_s1, %s1318_s1, %s1319_s29  }
  0x11   :  { %s32_s18 = sshll.u32 %s1321_s7, 4  ;;  %s56_s21 = sshll.u32 %s1478_s2, 4  ;;  %s33_s18 = int_to_ptr.vmem [resolvable:$true] %s32_s18  ;;  %s57_s21 = int_to_ptr.hbm [resolvable:$true] %s56_s21 }
  0x12   :  { %38 = dma.hbm_to_vmem [thread:$0]  %s31_s16, 128, %s33_s18, [#allocation5], %s1318_s1, %s1318_s1, %s1319_s29  }
  0x13   :  { %s84_s23 = sshll.u32 %s1481_s5, 4  ;;  %s1322_s13 = smov [#allocation8]   ;;  %s85_s23 = int_to_ptr.hbm [resolvable:$true] %s84_s23 }
  0x14   :  { %s58_s24 = sshll.u32 %s1322_s13, 4  ;;  %s1323_s25 = smov [#allocation11]   ;;  %s59_s24 = int_to_ptr.vmem [resolvable:$true] %s58_s24 }
  0x15   :  { %64 = dma.hbm_to_vmem [thread:$0]  %s57_s21, 128, %s59_s24, [#allocation7], %s1318_s1, %s1318_s1, %s1319_s29  }
  0x16   :  { %s86_s2 = sshll.u32 %s1323_s25, 4  ;;  %s1324_s26 = smov 128   ;;  %s87_s2 = int_to_ptr.vmem [resolvable:$true] %s86_s2 }
  0x17   :  { %s1325_s27 = smov 8   ;;  %s112_s15 = sshll.u32 %s1484_s8, 4  ;;  %s113_s15 = int_to_ptr.hbm [resolvable:$true] %s112_s15 }
  0x18   :  { %92 = dma.hbm_to_vmem [thread:$0]  %s85_s23, 1024, %s87_s2, [#allocation10], %s1324_s26, %s1324_s26, %s1325_s27  }
  0x19   :  { %s1326_s5 = smov [#allocation14]   ;;  %s127_s7 = sshll.u32 %s1486_s10, 4  ;;  %s128_s7 = int_to_ptr.hbm [resolvable:$true] %s127_s7 }
  0x1a   :  { %s114_s16 = sshll.u32 %s1326_s5, 4  ;;  %s1327_s18 = smov [#allocation15]   ;;  %s115_s16 = int_to_ptr.vmem [resolvable:$true] %s114_s16 }
  0x1b   :  { %120 = dma.hbm_to_vmem [thread:$0]  %s113_s15, 2048, %s115_s16, [#allocation13], %s1318_s1, %s1318_s1, %s1319_s29  }
  0x1c   :  { %s129_s19 = sshll.u32 %s1327_s18, 4  ;;  %s130_s19 = int_to_ptr.vmem [resolvable:$true] %s129_s19 }
  0x1d   :  { %135 = dma.hbm_to_vmem [thread:$0]  %s128_s7, 1024, %s130_s19, [#allocation16], %s1318_s1, %s1318_s1, %s1319_s29  }
  0x1e   :  { %1304 = dma.done.wait [#allocation5], 128  }
  0x1f   :  { %1305 = vsyncadd [#allocation5], 4294967168 }
  0x20   :  { %1306 = dma.done.wait [#allocation7], 640  }
  0x21   :  { %1307 = vsyncadd [#allocation7], 4294966656 }
  0x22   :  { %1308 = dma.done.wait [#allocation10], 2048  }
  0x23   :  { %1309 = vsyncadd [#allocation10], 4294965248 }
  0x24   :  { %1310 = dma.done.wait [#allocation13], 3072  }
  0x25   :  { %1311 = vsyncadd [#allocation13], 4294964224 }
  0x26   :  { %1312 = dma.done.wait [#allocation16], 1024  }
  0x27   :  { %1313 = vsyncadd [#allocation16], 4294966272  ;;  %v1035_v1 = vld [vmem:[#allocation9 + $0x38] sm:$0xff]  ;;  %v887_v2 = vld [vmem:[#allocation11 + $0x30] sm:$0xf]  ;;  %vm347_vm0 = vcmask 523264  }
  0x28   :  { %v1044_v3 = vld [vmem:[#allocation11 + $0x34] sm:$0xf0]  ;;  %v1043_v5 = vld [vmem:[#allocation11 + $0x34] sm:$0xf]  ;;  %v889_v6 = vld [vmem:[#allocation11 + $0x38] sm:$0xf0]  ;;  %255 = vmatpush.bf16.msra.mxu0 %v1035_v1 }
  0x29   :  { %v888_v4 = vor.u32 %v1044_v3, %v887_v2  ;;  %v1034_v7 = vld [vmem:[#allocation9 + $0x30] sm:$0xff]  ;;  %v892_v8 = vor.u32 %v1043_v5, %v889_v6  ;;  %v879_v9 = vld [vmem:[#allocation11 + $0x20] sm:$0xf]  ;;  %v1042_v10 = vld [vmem:[#allocation11 + $0x24] sm:$0xf0] }
  0x2a   :  { %v1041_v11 = vld [vmem:[#allocation11 + $0x24] sm:$0xf]  ;;  %v880_v12 = vor.u32 %v1042_v10, %v879_v9  ;;  %v881_v13 = vld [vmem:[#allocation11 + $0x28] sm:$0xf0]  ;;  %v871_v15 = vld [vmem:[#allocation11 + $0x10] sm:$0xf] }
  0x2b   :  { %355 = vmatpush.bf16.msra.mxu1 %v888_v4  ;;  %369 = vmatpush.bf16.msra.mxu2 %v892_v8  ;;  %v884_v14 = vor.u32 %v1041_v11, %v881_v13  ;;  %v1040_v16 = vld [vmem:[#allocation11 + $0x14] sm:$0xf0]  ;;  %v1039_v17 = vld [vmem:[#allocation11 + $0x14] sm:$0xf]  ;;  %v873_v18 = vld [vmem:[#allocation11 + $0x18] sm:$0xf0] }
  0x2c   :  { %256 = vmatpush.bf16.msra.mxu0 %v1034_v7  ;;  %v1033_v19 = vld [vmem:[#allocation9 + $0x28] sm:$0xff]  ;;  %v872_v20 = vor.u32 %v1040_v16, %v871_v15  ;;  %v876_v21 = vor.u32 %v1039_v17, %v873_v18  ;;  %v1032_v22 = vld [vmem:[#allocation9 + $0x20] sm:$0xff]  ;;  %v1036_v29 = vld [vmem:[#allocation8] sm:$0xff] }
  0x2d   :  { %v863_v23 = vld [vmem:[#allocation11] sm:$0xf]  ;;  %v1038_v24 = vld [vmem:[#allocation11 + $0x4] sm:$0xf0]  ;;  %v1037_v25 = vld [vmem:[#allocation11 + $0x4] sm:$0xf] }
  0x2e   :  { %v865_v26 = vld [vmem:[#allocation11 + $0x8] sm:$0xf0]  ;;  %v864_v27 = vor.u32 %v1038_v24, %v863_v23  ;;  %v1031_v30 = vld [vmem:[#allocation9 + $0x18] sm:$0xff]  ;;  %v1030_v31 = vld [vmem:[#allocation9 + $0x10] sm:$0xff] }
  0x2f   :  { %356 = vmatpush.bf16.msra.mxu1 %v880_v12  ;;  %370 = vmatpush.bf16.msra.mxu2 %v884_v14  ;;  %v868_v28 = vor.u32 %v1037_v25, %v865_v26  ;;  %v1029_v32 = vld [vmem:[#allocation9 + $0x8] sm:$0xff]  ;;  %v1028_v33 = vld [vmem:[#allocation9] sm:$0xff]  ;;  %v1027_v34 = vld [vmem:[#allocation4] sm:$0xff] }
  0x30   :  { %257 = vmatpush.bf16.msra.mxu0 %v1033_v19  ;;  %v1052_v35 = vld [vmem:[#allocation12 + $0x38] sm:$0xff]  ;;  %v1051_v36 = vld [vmem:[#allocation12 + $0x30] sm:$0xff]  ;;  %v1050_v37 = vld [vmem:[#allocation12 + $0x28] sm:$0xff] }
  0x31   :  { %v1049_v38 = vld [vmem:[#allocation12 + $0x20] sm:$0xff]  ;;  %v1060_v39 = vld [vmem:[#allocation14 + $0x38] sm:$0xff]  ;;  %v1059_v41 = vld [vmem:[#allocation14 + $0x30] sm:$0xff] }
  0x32   :  { %610 = vmatpush.bf16.msra.mxu3 %v1060_v39  ;;  %v1048_v40 = vld [vmem:[#allocation12 + $0x18] sm:$0xff]  ;;  %v1047_v43 = vld [vmem:[#allocation12 + $0x10] sm:$0xff]  ;;  %v1058_v44 = vld [vmem:[#allocation14 + $0x28] sm:$0xff] }
  0x33   :  { %357 = vmatpush.bf16.msra.mxu1 %v872_v20  ;;  %371 = vmatpush.bf16.msra.mxu2 %v876_v21  ;;  %v1068_v42 = vld [vmem:[#allocation14 + $0x78] sm:$0xff]  ;;  %v1067_v45 = vld [vmem:[#allocation14 + $0x70] sm:$0xff]  ;;  %v1046_v46 = vld [vmem:[#allocation12 + $0x8] sm:$0xff] }
  0x34   :  { %258 = vmatpush.bf16.msra.mxu0 %v1032_v22  ;;  %v1057_v47 = vld [vmem:[#allocation14 + $0x20] sm:$0xff]  ;;  %v1066_v48 = vld [vmem:[#allocation14 + $0x68] sm:$0xff]  ;;  %v1056_v51 = vld [vmem:[#allocation14 + $0x18] sm:$0xff] }
  0x35   :  { %v296_v49 = vld [vmem:[%s1482_s6] sm:$0x3]  ;;  %v1045_v50 = vld [vmem:[#allocation12] sm:$0xff]  ;;  %v1064_v57 = vld [vmem:[#allocation14 + $0x58] sm:$0xff] }
  0x36   :  { %611 = vmatpush.bf16.msra.mxu3 %v1059_v41  ;;  %v298_v52 = vperm.slane %v296_v49, 0  ;;  %v1065_v53 = vld [vmem:[#allocation14 + $0x60] sm:$0xff]  ;;  %v1055_v54 = vld [vmem:[#allocation14 + $0x10] sm:$0xff]  ;;  %v1054_v59 = vld [vmem:[#allocation14 + $0x8] sm:$0xff]  ;;  %v299_v60 = vperm.slane %v296_v49, 1 }
  0x37   :  { %358 = vmatpush.bf16.msra.mxu1 %v864_v27  ;;  %372 = vmatpush.bf16.msra.mxu2 %v868_v28  ;;  %v1063_v61 = vld [vmem:[#allocation14 + $0x50] sm:$0xff]  ;;  %v1053_v62 = vld [vmem:[#allocation14] sm:$0xff]  ;;  %v1062_v0 = vld [vmem:[#allocation14 + $0x48] sm:$0xff] }
  0x38   :  { %259 = vmatpush.bf16.msra.mxu0 %v1031_v30  ;;  %v1061_v7 = vld [vmem:[#allocation14 + $0x40] sm:$0xff]  ;;  %v1091_v12 = vld [vmem:[%s1480_s4] ss:$0 sm:$0xff] }
  0x3a   :  { %893 = vmatmul.msk.bf16.vlgmr.msra.gmra.mxu1 %vm347_vm0, %v1036_v29  ;;  %894 = vmatmul.msk.bf16.vlgmr.msra.gmra.mxu2 %vm347_vm0, %v1036_v29 }
  0x3b   :  { %686 = vmatpush.bf16.msrb.mxu2 %v1052_v35  ;;  %624 = vmatpush.bf16.msrb.mxu1 %v1068_v42 }
  0x3c   :  { %260 = vmatpush.bf16.msra.mxu0 %v1030_v31  ;;  %612 = vmatpush.bf16.msra.mxu3 %v1058_v44 }
  0x3f   :  { %687 = vmatpush.bf16.msrb.mxu2 %v1051_v36  ;;  %625 = vmatpush.bf16.msrb.mxu1 %v1067_v45 }
  0x40   :  { %261 = vmatpush.bf16.msra.mxu0 %v1029_v32  ;;  %613 = vmatpush.bf16.msra.mxu3 %v1057_v47 }
  0x43   :  { %688 = vmatpush.bf16.msrb.mxu2 %v1050_v37  ;;  %626 = vmatpush.bf16.msrb.mxu1 %v1066_v48 }
  0x44   :  { %262 = vmatpush.bf16.msra.mxu0 %v1028_v33  ;;  %614 = vmatpush.bf16.msra.mxu3 %v1056_v51  ;;  %v457_v51 = vld [vmem:[#allocation6 + $0x10] sm:$0xff] }
  0x47   :  { %263 = vmatmul.bf16.vlgmr.msra.gmra.mxu0 %v1027_v34  ;;  %689 = vmatpush.bf16.msrb.mxu2 %v1049_v38 }
  0x48   :  { %627 = vmatpush.bf16.msrb.mxu1 %v1065_v53  ;;  %615 = vmatpush.bf16.msra.mxu3 %v1055_v54 }
  0x4b   :  { %690 = vmatpush.bf16.msrb.mxu2 %v1048_v40 }
  0x4c   :  { %628 = vmatpush.bf16.msrb.mxu1 %v1064_v57  ;;  %616 = vmatpush.bf16.msra.mxu3 %v1054_v59 }
  0x4f   :  { %691 = vmatpush.bf16.msrb.mxu2 %v1047_v43 }
  0x50   :  { %629 = vmatpush.bf16.msrb.mxu1 %v1063_v61  ;;  %617 = vmatpush.bf16.msra.mxu3 %v1053_v62 }
  0x53   :  { %692 = vmatpush.bf16.msrb.mxu2 %v1046_v46 }
  0x54   :  { %630 = vmatpush.bf16.msrb.mxu1 %v1062_v0 }
  0x57   :  { %693 = vmatpush.bf16.msrb.mxu2 %v1045_v50  ;;  %v455_v50 = vld [vmem:[#allocation6] sm:$0xff] }
  0x58   :  { %631 = vmatpush.bf16.msrb.mxu1 %v1061_v7 }
  0xb7   :  { %v360_v55 = vpop.f32.mrf.mxu1 }
  0xb8   :  { %v361_v56 = vadd.f32 %v360_v55, %v298_v52 }
  0xba   :  { %v895_v58 = vmul.f32 -1.442695, %v361_v56 }
  0xbc   :  { %1096 = vpow2.f32 %v895_v58 }
  0xbd   :  { %v374_v63 = vpop.f32.mrf.mxu2 }
  0xbe   :  { %v375_v1 = vadd.f32 %v374_v63, %v299_v60 }
  0xbf   :  { %v362_v2 = vpop.f32.mrf.mxu1 }
  0xc0   :  { %v363_v3 = vadd.f32 %v362_v2, %v298_v52  ;;  %v896_v4 = vmul.f32 -1.442695, %v375_v1 }
  0xc2   :  { %v1097_v5 = vpop.eup %1096  ;;  %v897_v6 = vmul.f32 -1.442695, %v363_v3  ;;  %1098 = vpow2.f32 %v896_v4 }
  0xc3   :  { %v391_v8 = vadd.f32 1.0, %v1097_v5  ;;  %v456_v5 = vld [vmem:[#allocation6 + $0x8] sm:$0xff] }
  0xc4   :  { %1100 = vpow2.f32 %v897_v6  ;;  %v264_v10 = vpop.f32.mrf.mxu0  ;;  %v458_v6 = vld [vmem:[#allocation6 + $0x18] sm:$0xff] }
  0xc5   :  { %1102 = vrcp.f32 %v391_v8  ;;  %v376_v9 = vpop.f32.mrf.mxu2  ;;  %v282_v19 = vadd.f32 %v1091_v12, %v264_v10  ;;  %v406_v36 = vand.u32 2147483648, %v391_v8  ;;  %vm400_vm2 = vweird.f32 %v391_v8 }
  0xc6   :  { %v377_v11 = vadd.f32 %v376_v9, %v299_v60  ;;  %v404_v37 = vand.u32 2147483647, %v391_v8 }
  0xc7   :  { %v284_v23 = vmax.f32 %v282_v19, 0.0  ;;  %v407_v44 = vor.u32 1.1754944e-38, %v406_v36  ;;  %v1069_v19 = vld [vmem:[#allocation15] sm:$0xff]  ;;  %v1093_v36 = vld [vmem:[%s1487_s11] ss:$0 sm:$0xff] }
  0xc8   :  { %v1099_v13 = vpop.eup %1098  ;;  %v898_v14 = vmul.f32 -1.442695, %v377_v11  ;;  %vm405_vm5 = vcmp.eq.f32.partialorder %v404_v37, 8.507059e+37 }
  0xc9   :  { %v1454_v16 = vadd.f32 1.0, %v1099_v13  ;;  %v1075_v13 = vld [vmem:[#allocation15 + $0x30] sm:$0xff] }
  0xca   :  { %v1101_v15 = vpop.eup %1100  ;;  %1104 = vpow2.f32 %v898_v14  ;;  %v1074_v14 = vld [vmem:[#allocation15 + $0x28] sm:$0xff] }
  0xcb   :  { %v1103_v17 = vpop.eup %1102  ;;  %v393_v18 = vadd.f32 1.0, %v1101_v15  ;;  %1106 = vrcp.f32 %v1454_v16  ;;  %v421_v54 = vand.u32 2147483648, %v1454_v16  ;;  %vm415_vm10 = vweird.f32 %v1454_v16  ;;  %v1073_v15 = vld [vmem:[#allocation15 + $0x20] sm:$0xff] }
  0xcc   :  { %v396_v20 = vmul.f32 %v1103_v17, %v391_v8  ;;  %v266_v21 = vpop.f32.mrf.mxu0  ;;  %vm401_vm1 = vweird.f32 %v1103_v17  ;;  %v419_v57 = vand.u32 2147483647, %v1454_v16 }
  0xcd   :  { %1108 = vrcp.f32 %v393_v18  ;;  %v283_v24 = vadd.f32 %v1091_v12, %v266_v21  ;;  %v436_v39 = vand.u32 2147483648, %v393_v18  ;;  %vm402_vm3 = vmor %vm400_vm2, %vm401_vm1  ;;  %v434_v43 = vand.u32 2147483647, %v393_v18  ;;  %v1076_v12 = vld [vmem:[#allocation15 + $0x38] sm:$0xff] }
  0xce   :  { %v397_v22 = vsub.f32 1.0, %v396_v20  ;;  %vm430_vm6 = vweird.f32 %v393_v18  ;;  %v422_v1 = vor.u32 1.1754944e-38, %v421_v54  ;;  %vm420_vm13 = vcmp.eq.f32.partialorder %v419_v57, 8.507059e+37  ;;  %777 = vmatpush.bf16.msrb.mxu0 %v1076_v12 }
  0xcf   :  { %v285_v27 = vmax.f32 %v283_v24, 0.0  ;;  %v437_v47 = vor.u32 1.1754944e-38, %v436_v39  ;;  %vm435_vm9 = vcmp.eq.f32.partialorder %v434_v43, 8.507059e+37  ;;  %v1094_v39 = vld [vmem:[%s1488_s12] ss:$0 sm:$0xff]  ;;  %vm809_vm1 = vcmask 7168  }
  0xd0   :  { %v398_v25 = vmul.f32 %v1103_v17, %v397_v22  ;;  %v1105_v26 = vpop.eup %1104 }
  0xd1   :  { %v1107_v28 = vpop.eup %1106  ;;  %v394_v29 = vadd.f32 1.0, %v1105_v26  ;;  %v463_v32 = vpack.c.bf16 %v285_v27, %v284_v23 }
  0xd2   :  { %v411_v31 = vmul.f32 %v1107_v28, %v1454_v16  ;;  %v399_v33 = vadd.f32 %v1103_v17, %v398_v25  ;;  %vm416_vm8 = vweird.f32 %v1107_v28  ;;  %778 = vmatpush.bf16.msrb.mxu0 %v1075_v13  ;;  %v1072_v16 = vld [vmem:[#allocation15 + $0x18] sm:$0xff]  ;;  %v1092_v25 = vld [vmem:[%s1485_s9] ss:$0 sm:$0xff] }
  0xd3   :  { %v1109_v30 = vpop.eup %1108  ;;  %1110 = vrcp.f32 %v394_v29  ;;  %694 = vmatmul.bf16.vlgmr.msrb.gmra.mxu2 %v463_v32  ;;  %vm417_vm11 = vmor %vm415_vm10, %vm416_vm8  ;;  %v451_v60 = vand.u32 2147483648, %v394_v29  ;;  %v449_v63 = vand.u32 2147483647, %v394_v29  ;;  %vm445_vm14 = vweird.f32 %v394_v29 }
  0xd4   :  { %v426_v34 = vmul.f32 %v1109_v30, %v393_v18  ;;  %v412_v35 = vsub.f32 1.0, %v411_v31  ;;  %v403_v41 = vsel %vm402_vm3, %v1103_v17, %v399_v33  ;;  %vm431_vm4 = vweird.f32 %v1109_v30  ;;  %v1071_v17 = vld [vmem:[#allocation15 + $0x10] sm:$0xff]  ;;  %v1070_v18 = vld [vmem:[#allocation15 + $0x8] sm:$0xff] }
  0xd5   :  { %v408_v49 = vsel %vm405_vm5, %v407_v44, %v403_v41  ;;  %vm432_vm7 = vmor %vm430_vm6, %vm431_vm4  ;;  %v452_v4 = vor.u32 1.1754944e-38, %v451_v60  ;;  %vm450_vm0 = vcmp.eq.f32.partialorder %v449_v63, 8.507059e+37 }
  0xd6   :  { %v427_v38 = vsub.f32 1.0, %v426_v34  ;;  %v413_v40 = vmul.f32 %v1107_v28, %v412_v35  ;;  %v459_v58 = vmul.f32 %v455_v50, %v408_v49  ;;  %779 = vmatpush.bf16.msrb.mxu0 %v1074_v14 }
  0xd8   :  { %v428_v42 = vmul.f32 %v1109_v30, %v427_v38  ;;  %v414_v52 = vadd.f32 %v1107_v28, %v413_v40 }
  0xd9   :  { %v1111_v45 = vpop.eup %1110 }
  0xda   :  { %v429_v46 = vadd.f32 %v1109_v30, %v428_v42  ;;  %v441_v48 = vmul.f32 %v1111_v45, %v394_v29  ;;  %v418_v61 = vsel %vm417_vm11, %v1107_v28, %v414_v52  ;;  %vm446_vm12 = vweird.f32 %v1111_v45  ;;  %780 = vmatpush.bf16.msrb.mxu0 %v1073_v15 }
  0xdb   :  { %v423_v3 = vsel %vm420_vm13, %v422_v1, %v418_v61  ;;  %vm447_vm15 = vmor %vm445_vm14, %vm446_vm12 }
  0xdc   :  { %v433_v53 = vsel %vm432_vm7, %v1109_v30, %v429_v46  ;;  %v442_v55 = vsub.f32 1.0, %v441_v48  ;;  %v460_v9 = vmul.f32 %v456_v5, %v423_v3  ;;  %v1095_v46 = vld [vmem:[#allocation3] ss:$0 sm:$0xff] }
  0xdd   :  { %v438_v56 = vsel %vm435_vm9, %v437_v47, %v433_v53 }
  0xde   :  { %v461_v59 = vmul.f32 %v457_v51, %v438_v56  ;;  %v443_v62 = vmul.f32 %v1111_v45, %v442_v55  ;;  %781 = vmatpush.bf16.msrb.mxu0 %v1072_v16 }
  0xe0   :  { %v480_v0 = vpack.c.bf16 %v461_v59, %v459_v58  ;;  %v444_v2 = vadd.f32 %v1111_v45, %v443_v62 }
  0xe2   :  { %618 = vmatmul.bf16.vlgmr.msra.gmra.mxu3 %v480_v0  ;;  %v448_v7 = vsel %vm447_vm15, %v1111_v45, %v444_v2  ;;  %782 = vmatpush.bf16.msrb.mxu0 %v1071_v17 }
  0xe3   :  { %v453_v8 = vsel %vm450_vm0, %v452_v4, %v448_v7 }
  0xe4   :  { %v462_v10 = vmul.f32 %v458_v6, %v453_v8 }
  0xe6   :  { %v481_v11 = vpack.c.bf16 %v462_v10, %v460_v9  ;;  %783 = vmatpush.bf16.msrb.mxu0 %v1070_v18 }
  0xe8   :  { %632 = vmatmul.bf16.vlgmr.msrb.gmra.mxu1 %v481_v11 }
  0xea   :  { %784 = vmatpush.bf16.msrb.mxu0 %v1069_v19 }
 0x156   :  { %v695_v21 = vpop.f32.mrf.mxu2 }
 0x15e   :  { %v697_v29 = vpop.f32.mrf.mxu2 }
 0x165   :  { %v619_v20 = vpop.f32.mrf.mxu3  ;;  %v633_v22 = vpop.f32.mrf.mxu1 }
 0x166   :  { %v634_v23 = vadd.f32 %v633_v22, %v619_v20 }
 0x168   :  { %v696_v24 = vadd.f32 %v695_v21, %v634_v23 }
 0x16a   :  { %v704_v30 = vadd.f32 %v1092_v25, %v696_v24 }
 0x16c   :  { %v706_v33 = vmax.f32 %v704_v30, 0.0 }
 0x16d   :  { %v621_v26 = vpop.f32.mrf.mxu3  ;;  %v635_v27 = vpop.f32.mrf.mxu1 }
 0x16e   :  { %v636_v28 = vadd.f32 %v635_v27, %v621_v26 }
 0x170   :  { %v698_v31 = vadd.f32 %v697_v29, %v636_v28 }
 0x172   :  { %v705_v32 = vadd.f32 %v1092_v25, %v698_v31 }
 0x174   :  { %v707_v34 = vmax.f32 %v705_v32, 0.0 }
 0x176   :  { %v708_v35 = vpack.c.bf16 %v707_v34, %v706_v33 }
 0x178   :  { %785 = vmatmul.bf16.vlgmr.msrb.gmra.mxu0 %v708_v35 }
 0x1f5   :  { %v786_v37 = vpop.f32.mrf.mxu0 }
 0x1f6   :  { %v787_v38 = vadd.f32 %v1093_v36, %v786_v37 }
 0x1f8   :  { %v791_v40 = vmax.f32 %v787_v38, 0.0 }
 0x1fa   :  { %v797_v41 = vmul.f32 %v1094_v39, %v791_v40 }
 0x1fc   :  { %799 = vadd.xlane.f32.xlu0 %v797_v41 }
 0x1fd   :  { %v788_v42 = vpop.f32.mrf.mxu0 }
 0x1fe   :  { %v789_v43 = vadd.f32 %v1093_v36, %v788_v42 }
 0x200   :  { %v792_v44 = vmax.f32 %v789_v43, 0.0 }
 0x202   :  { %v798_v45 = vmul.f32 %v1094_v39, %v792_v44 }
 0x204   :  { %801 = vadd.xlane.f32.xlu0 %v798_v45 }
 0x26f   :  { %v800_v47 = vpop.xlane.xlu0 %799 }
 0x270   :  { %v807_v48 = vadd.f32 %v1095_v46, %v800_v47 }
 0x272   :  { %810 = vst.msk [vmem:[%s1490_s14] sm:$0xff] %vm809_vm1, %v807_v48 }
 0x277   :  { %v802_v49 = vpop.xlane.xlu0 %801 }
 0x278   :  { %v808_v50 = vadd.f32 %v1095_v46, %v802_v49 }
 0x27a   :  { %811 = vst.msk [vmem:[%s1490_s14 + $0x8] sm:$0xff] %vm809_vm1, %v808_v50 }
 0x27b   :  { %816 = vsyncpa [#allocation5], 1 }
 0x27c   :  { %817 = vsyncpa [#allocation7], 1 }
 0x27d   :  { %818 = vsyncpa [#allocation10], 1 }
 0x27e   :  { %819 = vsyncpa [#allocation13], 1 }
 0x27f   :  { %820 = vsyncpa [#allocation16], 1 }

</bundles_post_ra>
